<compile_context>
chip_gen: v7x
topology: tpu7x:2x2x1
jax: 0.10.0
libtpu: 0.0.40
codegen_flags: <defaults>
</compile_context>

<pallas_src>
import functools

import jax
import jax.numpy as jnp
from jax.experimental import pallas as pl
from jax.experimental.pallas import tpu as pltpu

EPS = 1e-5                               # torch.nn.LayerNorm default


# ---------------------------------------------------------------------------
# in-kernel math helpers (all f32)
# ---------------------------------------------------------------------------
def _erf(x):
    # Abramowitz & Stegun 7.1.26 rational approximation (|err| < 1.5e-7) so the
    # kernel matches torch's exact-erf nn.GELU to float32 precision.
    a1, a2, a3, a4, a5 = 0.254829592, -0.284496736, 1.421413741, -1.453152027, 1.061405429
    p = 0.3275911
    sgn = jnp.where(x >= 0.0, 1.0, -1.0)
    ax = jnp.abs(x)
    t = 1.0 / (1.0 + p * ax)
    poly = ((((a5 * t + a4) * t + a3) * t + a2) * t + a1) * t
    return sgn * (1.0 - poly * jnp.exp(-ax * ax))


def _gelu_exact(x):
    return 0.5 * x * (1.0 + _erf(x * 0.7071067811865476))


def _layernorm(x, w, b):
    mu = jnp.mean(x, axis=-1, keepdims=True)
    xc = x - mu
    var = jnp.mean(xc * xc, axis=-1, keepdims=True)
    return xc * jax.lax.rsqrt(var + EPS) * w + b


# ---------------------------------------------------------------------------
# hardware-derived scoped-VMEM limit (leave headroom on v7x's 64 MiB)
# ---------------------------------------------------------------------------
@functools.lru_cache(maxsize=1)
def _vmem_limit_bytes():
    try:
        cap = int(pltpu.get_tpu_info().vmem_capacity_bytes)
        return min(100 * 1024 * 1024, (cap * 3) // 4)   # 96 MiB v5e/v6e, 48 MiB v7x
    except Exception:
        return 48 * 1024 * 1024


# ---------------------------------------------------------------------------
# probe: is single-buffering of constant-index weight blocks (pl.Buffered(1))
# supported by this JAX/Mosaic?  Falls back to default double-buffering if not.
# ---------------------------------------------------------------------------
@functools.lru_cache(maxsize=1)
def _single_buffer_weights_supported():
    if not hasattr(pl, "Buffered"):
        return False

    def _copy(src_ref, dst_ref):
        dst_ref[...] = src_ref[...]

    try:
        probe = pl.pallas_call(
            _copy,
            grid=(2,),
            in_specs=[pl.BlockSpec((8, 128), lambda i: (0, 0),
                                   pipeline_mode=pl.Buffered(1))],
            out_specs=pl.BlockSpec((8, 128), lambda i: (0, 0)),
            out_shape=jax.ShapeDtypeStruct((8, 128), jnp.float32),
        )
        jax.block_until_ready(probe(jnp.ones((8, 128), jnp.float32)))
        return True
    except Exception:   # any failure -> default buffering (still correct)
        return False


# ---------------------------------------------------------------------------
# batch-block selection:
#   * bt must divide B, and (bt % 8 == 0 or bt == B) so every 2-D block keeps
#     its second-to-last dim either 8-aligned or full (the (8,128) rule).
#   * bt is capped by a rough per-step VMEM budget (matters on v7x's 64 MiB).
#   * prefer >= 2 grid steps and an even grid so both v7x TensorCores stay busy.
# ---------------------------------------------------------------------------
def _pick_block_batch(b, n, c, vmem_limit, block_batch=None):
    per_batch_bytes = 8 * n * c * 4        # x blk (x2), prelim blk (x2), xn2, kv (x2), slack
    mem_cap = max(1, int((vmem_limit // 2) // max(per_batch_bytes, 1)))
    cands = [bt for bt in range(1, b + 1)
             if b % bt == 0 and (bt % 8 == 0 or bt == b)]
    if block_batch is not None:
        limited = [bt for bt in cands if bt <= int(block_batch)]
        cands = limited or cands[:1]
    fitting = [bt for bt in cands if bt <= mem_cap] or cands[:1]

    def score(bt):
        steps = b // bt
        return (steps >= 2 or b == 1,                 # keep both v7x cores busy
                steps % 2 == 0 or steps == 1,         # even grid
                bt)                                   # then largest block
    return max(fitting, key=score)


# ---------------------------------------------------------------------------
# Kernel 1: norm1 + ClassAttention head path + fused rows>0 residual write.
#   x2_ref:   (bt*N, C) f32  -- bt batches of tokens flattened along rows.
#   x0_ref:   (bt, C)   f32  -- the bt class rows of x (for the batched q matmul).
#   qw_ref:   (C, C)  bf16   -- q weight, pre-transposed, 1/sqrt(ch) pre-folded.
#   kvw_ref:  (C, 2C) bf16   -- fused [k|v] weight, pre-transposed.
#   mcf/mhc:  (C, H)/(H, C)  f32 block-diagonal head masks.
#   outputs:  head_out (bt, C)   per-batch attn@v (heads concatenated),
#             prelim   (bt*N, C) 2*(x + gamma1*norm1(x))  (class rows patched later).
# ---------------------------------------------------------------------------
def _attn_kernel(x2_ref, x0_ref, n1w_ref, n1b_ref, qw_ref, kvw_ref,
                 mcf_ref, mhc_ref, g1_ref, head_out_ref, prelim_ref):
    bt = head_out_ref.shape[0]
    rows, c = x2_ref.shape
    n = rows // bt

    n1w = n1w_ref[...]
    n1b = n1b_ref[...]
    x2 = x2_ref[...]
    xn2 = _layernorm(x2, n1w, n1b)                               # (bt*N, C) f32

    # fused rows>0 result: final rows>0 = x1 + x1 = 2*(x + gamma1*norm1(x)).
    # (class rows are overwritten in place by kernel 2.)
    prelim_ref[...] = 2.0 * (x2 + g1_ref[...] * xn2)

    # fused k/v projection: one big bf16 MXU matmul for the whole batch block
    kv = jnp.dot(xn2.astype(jnp.bfloat16), kvw_ref[...],
                 preferred_element_type=jnp.float32)             # (bt*N, 2C) f32

    # batched q projection for the bt class rows (M = bt on the MXU; scale folded)
    xn_cls = _layernorm(x0_ref[...], n1w, n1b)                   # (bt, C)
    q = jnp.dot(xn_cls.astype(jnp.bfloat16), qw_ref[...],
                preferred_element_type=jnp.float32)              # (bt, C)

    mcf = mcf_ref[...]
    mhc = mhc_ref[...]

    # per-batch class-attention; bt is a small static int -> unrolled python loop
    rows_out = []
    for j in range(bt):
        r0 = j * n
        k_j = kv[r0:r0 + n, :c]                                  # (N, C)
        v_j = kv[r0:r0 + n, c:]                                  # (N, C)
        q_j = q[j:j + 1, :]                                      # (1, C)

        # per-head scores via block-diagonal mask matmul: (N, C) @ (C, H) -> (N, H)
        scores = jnp.dot(k_j * q_j, mcf, preferred_element_type=jnp.float32)

        # softmax over the token axis, per head (f32)
        smax = jnp.max(scores, axis=0, keepdims=True)
        e = jnp.exp(scores - smax)
        attn = e * pl.reciprocal(jnp.sum(e, axis=0, keepdims=True), approx=True)

        # token reduction on the MXU (lane-dense C-wide output): (N,H)^T . (N,C) -> (H,C)
        hc = jax.lax.dot_general(attn.astype(jnp.bfloat16), v_j.astype(jnp.bfloat16),
                                 (((0,), (0,)), ((), ())),
                                 preferred_element_type=jnp.float32)
        rows_out.append(jnp.sum(mhc * hc, axis=0, keepdims=True))   # (1, C)

    # single lane-dense (bt, C) store instead of bt masked row stores
    head_out_ref[...] = jnp.concatenate(rows_out, axis=0)


# ---------------------------------------------------------------------------
# Kernel 2: attention proj + residual + class-token MLP for ALL batches at once,
# then patch the class rows into the kernel-1 output IN PLACE (aliased output).
#   cls_ref:    (B, C)    f32 -- the (batch-mixed) class-attention output.
#   x0_ref:     (B, C)    f32 -- x[:, 0, :] (residual base for the class row).
#   prelim_ref: (B, r, C) f32 -- first r (= min(8, N)) rows of kernel 1's output.
#   o_ref:      (B, r, C) f32 -- same slab of the final (aliased) output buffer.
# ---------------------------------------------------------------------------
def _cls_mlp_patch_kernel(cls_ref, x0_ref, pw_ref, pb_ref, g1_ref, g2_ref,
                          f1w_ref, f1b_ref, lnw_ref, lnb_ref, f2w_ref, f2b_ref,
                          prelim_ref, o_ref):
    attn_cls = jnp.dot(cls_ref[...].astype(jnp.bfloat16), pw_ref[...],
                       preferred_element_type=jnp.float32) + pb_ref[...]     # (B, C)
    x1_0 = x0_ref[...] + g1_ref[...] * attn_cls                              # (B, C)

    # MLP on the class tokens (applied to x1, NOT norm2(x1), as in the source)
    h = jnp.dot(x1_0.astype(jnp.bfloat16), f1w_ref[...],
                preferred_element_type=jnp.float32) + f1b_ref[...]
    h = _gelu_exact(h)
    h = _layernorm(h, lnw_ref[...], lnb_ref[...])
    h = jnp.dot(h.astype(jnp.bfloat16), f2w_ref[...],
                preferred_element_type=jnp.float32) + f2b_ref[...]

    row0 = x1_0 + g2_ref[...] * h                                            # (B, C)

    # patch row 0 of every batch; rows 1..r-1 pass through unchanged, rows >= r
    # never leave the aliased HBM buffer.
    slab = prelim_ref[...]                                                   # (B, r, C)
    tok = jax.lax.broadcasted_iota(jnp.int32, (1, slab.shape[1], 1), 1)
    o_ref[...] = jnp.where(tok == 0, row0[:, None, :], slab)


# ---------------------------------------------------------------------------
# one-time parameter preparation: transpose, fold 1/sqrt(ch) into q, cast matmul
# weights to bf16, build the block-diagonal head masks.
# ---------------------------------------------------------------------------
def prepare_weights(params, num_heads):
    c = params["norm1_w"].shape[0]
    ch = c // num_heads
    scale = ch ** -0.5
    wdt = jnp.bfloat16
    head_of_chan = jnp.arange(c, dtype=jnp.int32) // ch
    mask_cf = (head_of_chan[:, None] ==
               jnp.arange(num_heads, dtype=jnp.int32)[None, :]).astype(jnp.float32)
    return {
        "norm1_w": params["norm1_w"][None].astype(jnp.float32),
        "norm1_b": params["norm1_b"][None].astype(jnp.float32),
        "q_w_t": (params["q_w"].T * scale).astype(wdt),          # (C, C), scale folded
        "kv_w_t": params["kv_w"].T.astype(wdt),                  # (C, 2C) fused k|v
        "mask_cf": mask_cf,                                      # (C, H)
        "mask_hc": mask_cf.T,                                    # (H, C)
        "proj_w_t": params["proj_w"].T.astype(wdt),
        "proj_b": params["proj_b"][None].astype(jnp.float32),
        "gamma1": params["gamma1"][None].astype(jnp.float32),
        "gamma2": params["gamma2"][None].astype(jnp.float32),
        "fc1_w_t": params["fc1_w"].T.astype(wdt),
        "fc1_b": params["fc1_b"][None].astype(jnp.float32),
        "mlp_norm_w": params["mlp_norm_w"][None].astype(jnp.float32),
        "mlp_norm_b": params["mlp_norm_b"][None].astype(jnp.float32),
        "fc2_w_t": params["fc2_w"].T.astype(wdt),
        "fc2_b": params["fc2_b"][None].astype(jnp.float32),
    }


# ---------------------------------------------------------------------------
# wrapper
# ---------------------------------------------------------------------------
def class_attention_block(x, prep, num_heads, block_batch=None):
    b, n, c = x.shape
    ch = c // num_heads
    hidden = prep["fc1_w_t"].shape[1]
    vmem_limit = _vmem_limit_bytes()
    bt = _pick_block_batch(b, n, c, vmem_limit, block_batch)
    single_buf = _single_buffer_weights_supported()

    def wspec(shape):
        # constant-index weight block; single-buffer it when supported to halve
        # its VMEM residency (matters on v7x's 64 MiB VMEM at real sizes).
        if single_buf:
            return pl.BlockSpec(shape, lambda *_: (0,) * len(shape),
                                pipeline_mode=pl.Buffered(1))
        return pl.BlockSpec(shape, lambda *_: (0,) * len(shape))

    # ---- kernel 1: attention head path + fused rows>0 residual write ----
    x2d = x.reshape(b * n, c)                 # free layout-preserving reshape
    x0 = x[:, 0, :]                           # (B, C) class rows (also kernel-2 residual)
    head_out, prelim = pl.pallas_call(
        _attn_kernel,
        grid=(b // bt,),
        in_specs=[
            pl.BlockSpec((bt * n, c), lambda i: (i, 0)),
            pl.BlockSpec((bt, c), lambda i: (i, 0)),
            wspec((1, c)), wspec((1, c)),
            wspec((c, c)), wspec((c, 2 * c)),
            wspec((c, num_heads)), wspec((num_heads, c)),
            wspec((1, c)),
        ],
        out_specs=[pl.BlockSpec((bt, c), lambda i: (i, 0)),
                   pl.BlockSpec((bt * n, c), lambda i: (i, 0))],
        out_shape=(jax.ShapeDtypeStruct((b, c), jnp.float32),
                   jax.ShapeDtypeStruct((b * n, c), jnp.float32)),
        compiler_params=pltpu.CompilerParams(
            dimension_semantics=("parallel",),
            vmem_limit_bytes=vmem_limit),
    )(x2d, x0, prep["norm1_w"], prep["norm1_b"], prep["q_w_t"], prep["kv_w_t"],
      prep["mask_cf"], prep["mask_hc"], prep["gamma1"])

    # ---- plain-JAX glue: exact replica of the torch chunk(keep-dim) ->
    #      transpose(1, 2) -> reshape(B, 1, C) sequence (tiny (B, C) permutation;
    #      for B > 1 it mixes batches, as in the source).
    t = head_out.reshape(1, b, num_heads, 1, ch)
    cls_mixed = jnp.swapaxes(t, 1, 2).reshape(b, c)              # (B, C)

    # ---- kernel 2: proj + residual + class-token MLP, all batches at once,
    #      patching the class rows in place via input_output_aliases. ----
    prelim3d = prelim.reshape(b, n, c)
    r = n if n <= 8 else 8                    # 8-sublane-aligned patch slab

    in_specs_k2 = [
        pl.BlockSpec((b, c), lambda i: (0, 0)),
        pl.BlockSpec((b, c), lambda i: (0, 0)),
        wspec((c, c)), wspec((1, c)),
        wspec((1, c)), wspec((1, c)),
        wspec((c, hidden)), wspec((1, hidden)),
        wspec((1, hidden)), wspec((1, hidden)),
        wspec((hidden, c)), wspec((1, c)),
        pl.BlockSpec((b, r, c), lambda i: (0, 0, 0)),   # aliased prelim slab
    ]
    out = pl.pallas_call(
        _cls_mlp_patch_kernel,
        grid=(1,),
        in_specs=in_specs_k2,
        out_specs=pl.BlockSpec((b, r, c), lambda i: (0, 0, 0)),
        out_shape=jax.ShapeDtypeStruct((b, n, c), jnp.float32),
        input_output_aliases={len(in_specs_k2) - 1: 0},
        compiler_params=pltpu.CompilerParams(vmem_limit_bytes=vmem_limit),
    )(cls_mixed, x0, prep["proj_w_t"], prep["proj_b"], prep["gamma1"],
      prep["gamma2"], prep["fc1_w_t"], prep["fc1_b"], prep["mlp_norm_w"],
      prep["mlp_norm_b"], prep["fc2_w_t"], prep["fc2_b"], prelim3d)
    return out


# ---------------------------------------------------------------------------
# deterministic parameter init (PyTorch weight convention: Linear weight = (out, in))
# ---------------------------------------------------------------------------
def init_params(key, c, mlp_ratio=4.0, layer_scale=1e-4):
    hidden = int(c * mlp_ratio)
    ks = jax.random.split(key, 5)
    std = 0.02
    return {
        "norm1_w": jnp.ones((c,), jnp.float32),
        "norm1_b": jnp.zeros((c,), jnp.float32),
        "q_w": std * jax.random.normal(ks[0], (c, c), jnp.float32),       # qkv_bias=False
        "kv_w": std * jax.random.normal(ks[1], (2 * c, c), jnp.float32),  # qkv_bias=False
        "proj_w": std * jax.random.normal(ks[2], (c, c), jnp.float32),
        "proj_b": 0.01 * jnp.arange(c, dtype=jnp.float32) / c,
        "gamma1": layer_scale * jnp.ones((c,), jnp.float32),
        "gamma2": layer_scale * jnp.ones((c,), jnp.float32),
        "fc1_w": std * jax.random.normal(ks[3], (hidden, c), jnp.float32),
        "fc1_b": 0.01 * jnp.ones((hidden,), jnp.float32),
        "mlp_norm_w": jnp.ones((hidden,), jnp.float32),
        "mlp_norm_b": jnp.zeros((hidden,), jnp.float32),
        "fc2_w": std * jax.random.normal(ks[4], (c, hidden), jnp.float32),
        "fc2_b": 0.01 * jnp.ones((c,), jnp.float32),
    }


# ---------------------------------------------------------------------------
# pure-JAX reference: direct transcription of the PyTorch forward (incl. chunk keep-dim)
# ---------------------------------------------------------------------------
def reference_forward(x, p, num_heads):
    b, n, c = x.shape
    ch = c // num_heads
    scale = ch ** -0.5

    def ln(z, w, bias):
        mu = z.mean(-1, keepdims=True)
        var = ((z - mu) ** 2).mean(-1, keepdims=True)
        return (z - mu) / jnp.sqrt(var + EPS) * w + bias

    xn = ln(x, p["norm1_w"], p["norm1_b"])
    q = (xn[:, 0] @ p["q_w"].T).reshape(b, 1, num_heads, ch).transpose(0, 2, 1, 3)
    kv = (xn @ p["kv_w"].T).reshape(b, n, 2, num_heads, ch).transpose(2, 0, 3, 1, 4)
    k, v = kv[0:1], kv[1:2]                                  # torch .chunk(2, dim=0) keeps the dim
    attn = (q @ jnp.swapaxes(k, -2, -1)) * scale             # (1, B, H, 1, N)
    attn = jax.nn.softmax(attn, axis=-1)
    ac = attn @ v                                            # (1, B, H, 1, ch)
    ac = jnp.swapaxes(ac, 1, 2).reshape(b, 1, c)             # torch .transpose(1, 2).reshape(B, 1, C)
    ac = ac @ p["proj_w"].T + p["proj_b"]
    y = jnp.concatenate([ac, xn[:, 1:]], axis=1)
    x1 = x + p["gamma1"] * y
    cls_in = x1[:, 0:1]
    h = cls_in @ p["fc1_w"].T + p["fc1_b"]
    h = jax.nn.gelu(h, approximate=False)
    h = ln(h, p["mlp_norm_w"], p["mlp_norm_b"])
    cls_tok = p["gamma2"] * (h @ p["fc2_w"].T + p["fc2_b"])
    return x1 + jnp.concatenate([cls_tok, x1[:, 1:]], axis=1)


if __name__ == "__main__":
    B, N, C, NUM_HEADS = 4, 8, 32, 4
    key = jax.random.PRNGKey(0)
    kx, kp = jax.random.split(key)
    x = jax.random.normal(kx, (B, N, C), jnp.float32)
    params = init_params(kp, C)
    prep = prepare_weights(params, NUM_HEADS)   # one-time transpose / scale-fold / bf16 cast

    fwd = jax.jit(lambda xx: class_attention_block(xx, prep, NUM_HEADS))
    out = jax.block_until_ready(fwd(x))

    with jax.default_matmul_precision("highest"):
        ref = reference_forward(x, params, NUM_HEADS)
    ref = jax.block_until_ready(ref)

    assert out.shape == (B, N, C) and out.dtype == jnp.float32
    if not jnp.allclose(out, ref, atol=1e-3, rtol=1e-3):
        raise AssertionError(
            f"mismatch vs reference, max abs err = {float(jnp.max(jnp.abs(out - ref)))}")
    print("KERNEL_OK")
</pallas_src>

<mosaic_0001>
module attributes {stable_mosaic.version = 11 : i64} {
  func.func @_attn_kernel(%arg0: i32, %arg1: memref<32x32xf32, #tpu.memory_space<vmem>>, %arg2: memref<4x32xf32, #tpu.memory_space<vmem>>, %arg3: memref<1x32xf32, #tpu.memory_space<vmem>>, %arg4: memref<1x32xf32, #tpu.memory_space<vmem>>, %arg5: memref<32x32xbf16, #tpu.memory_space<vmem>>, %arg6: memref<32x64xbf16, #tpu.memory_space<vmem>>, %arg7: memref<32x4xf32, #tpu.memory_space<vmem>>, %arg8: memref<4x32xf32, #tpu.memory_space<vmem>>, %arg9: memref<1x32xf32, #tpu.memory_space<vmem>>, %arg10: memref<4x32xf32, #tpu.memory_space<vmem>>, %arg11: memref<32x32xf32, #tpu.memory_space<vmem>>) attributes {dimension_semantics = [#tpu.dimension_semantics<parallel>], iteration_bounds = array<i64: 1>, scalar_prefetch = 0 : i64, scratch_operands = 0 : i64, tpu.core_type = #tpu.core_type<tc>, window_params = [{transform_indices = @transform_0, window_bounds = array<i64: 32, 32>}, {transform_indices = @transform_1, window_bounds = array<i64: 4, 32>}, {pipeline_mode = #tpu.pipeline_mode<synchronous>, transform_indices = @transform_2, window_bounds = array<i64: 1, 32>}, {pipeline_mode = #tpu.pipeline_mode<synchronous>, transform_indices = @transform_3, window_bounds = array<i64: 1, 32>}, {pipeline_mode = #tpu.pipeline_mode<synchronous>, transform_indices = @transform_4, window_bounds = array<i64: 32, 32>}, {pipeline_mode = #tpu.pipeline_mode<synchronous>, transform_indices = @transform_5, window_bounds = array<i64: 32, 64>}, {pipeline_mode = #tpu.pipeline_mode<synchronous>, transform_indices = @transform_6, window_bounds = array<i64: 32, 4>}, {pipeline_mode = #tpu.pipeline_mode<synchronous>, transform_indices = @transform_7, window_bounds = array<i64: 4, 32>}, {pipeline_mode = #tpu.pipeline_mode<synchronous>, transform_indices = @transform_8, window_bounds = array<i64: 1, 32>}, {transform_indices = @transform_9, window_bounds = array<i64: 4, 32>}, {transform_indices = @transform_10, window_bounds = array<i64: 32, 32>}]} {
    %c0 = arith.constant 0 : index
    %c0_0 = arith.constant 0 : index
    %0 = vector.load %arg3[%c0, %c0_0] : memref<1x32xf32, #tpu.memory_space<vmem>>, vector<1x32xf32>
    %c0_1 = arith.constant 0 : index
    %c0_2 = arith.constant 0 : index
    %1 = vector.load %arg4[%c0_1, %c0_2] : memref<1x32xf32, #tpu.memory_space<vmem>>, vector<1x32xf32>
    %c0_3 = arith.constant 0 : index
    %c0_4 = arith.constant 0 : index
    %2 = vector.load %arg1[%c0_3, %c0_4] : memref<32x32xf32, #tpu.memory_space<vmem>>, vector<32x32xf32>
    %cst = arith.constant dense<0.000000e+00> : vector<32xf32>
    %3 = vector.multi_reduction <add>, %2, %cst [1] : vector<32x32xf32> to vector<32xf32>
    %4 = vector.shape_cast %3 : vector<32xf32> to vector<32x1xf32>
    %cst_5 = arith.constant 3.200000e+01 : f32
    %5 = vector.broadcast %cst_5 : f32 to vector<32x1xf32>
    %6 = arith.divf %4, %5 : vector<32x1xf32>
    %7 = vector.broadcast %6 : vector<32x1xf32> to vector<32x32xf32>
    %8 = arith.subf %2, %7 : vector<32x32xf32>
    %9 = arith.mulf %8, %8 : vector<32x32xf32>
    %cst_6 = arith.constant dense<0.000000e+00> : vector<32xf32>
    %10 = vector.multi_reduction <add>, %9, %cst_6 [1] : vector<32x32xf32> to vector<32xf32>
    %11 = vector.shape_cast %10 : vector<32xf32> to vector<32x1xf32>
    %cst_7 = arith.constant 3.200000e+01 : f32
    %12 = vector.broadcast %cst_7 : f32 to vector<32x1xf32>
    %13 = arith.divf %11, %12 : vector<32x1xf32>
    %cst_8 = arith.constant 9.99999974E-6 : f32
    %14 = vector.broadcast %cst_8 : f32 to vector<32x1xf32>
    %15 = arith.addf %13, %14 : vector<32x1xf32>
    %16 = math.rsqrt %15 : vector<32x1xf32>
    %17 = vector.broadcast %16 : vector<32x1xf32> to vector<32x32xf32>
    %18 = arith.mulf %8, %17 : vector<32x32xf32>
    %19 = vector.broadcast %0 : vector<1x32xf32> to vector<32x32xf32>
    %20 = arith.mulf %18, %19 : vector<32x32xf32>
    %21 = vector.broadcast %1 : vector<1x32xf32> to vector<32x32xf32>
    %22 = arith.addf %20, %21 : vector<32x32xf32>
    %c0_9 = arith.constant 0 : index
    %c0_10 = arith.constant 0 : index
    %23 = vector.load %arg9[%c0_9, %c0_10] : memref<1x32xf32, #tpu.memory_space<vmem>>, vector<1x32xf32>
    %24 = vector.broadcast %23 : vector<1x32xf32> to vector<32x32xf32>
    %25 = arith.mulf %24, %22 : vector<32x32xf32>
    %26 = arith.addf %2, %25 : vector<32x32xf32>
    %cst_11 = arith.constant 2.000000e+00 : f32
    %27 = vector.broadcast %cst_11 : f32 to vector<32x32xf32>
    %28 = arith.mulf %27, %26 : vector<32x32xf32>
    %c0_12 = arith.constant 0 : index
    %c0_13 = arith.constant 0 : index
    %29 = vector.load %arg11[%c0_12, %c0_13] : memref<32x32xf32, #tpu.memory_space<vmem>>, vector<32x32xf32>
    tpu.vector_store %arg11[%c0_12, %c0_13], %28 {strides = array<i32>} : memref<32x32xf32, #tpu.memory_space<vmem>>, vector<32x32xf32>,
    %30 = arith.truncf %22 : vector<32x32xf32> to vector<32x32xbf16>
    %c0_14 = arith.constant 0 : index
    %c0_15 = arith.constant 0 : index
    %31 = vector.load %arg6[%c0_14, %c0_15] : memref<32x64xbf16, #tpu.memory_space<vmem>>, vector<32x64xbf16>
    %cst_16 = arith.constant dense<0.000000e+00> : vector<32x64xf32>
    %32 = tpu.matmul %30, %31, %cst_16 {dimension_numbers = #tpu.dot_dimension_numbers<[1], [0], [0], [1], [0, 0, 1, 1], [], []>} : vector<32x32xbf16>, vector<32x64xbf16>, vector<32x64xf32> -> vector<32x64xf32>
    %c0_17 = arith.constant 0 : index
    %c0_18 = arith.constant 0 : index
    %33 = vector.load %arg2[%c0_17, %c0_18] : memref<4x32xf32, #tpu.memory_space<vmem>>, vector<4x32xf32>
    %cst_19 = arith.constant dense<0.000000e+00> : vector<4xf32>
    %34 = vector.multi_reduction <add>, %33, %cst_19 [1] : vector<4x32xf32> to vector<4xf32>
    %35 = vector.shape_cast %34 : vector<4xf32> to vector<4x1xf32>
    %cst_20 = arith.constant 3.200000e+01 : f32
    %36 = vector.broadcast %cst_20 : f32 to vector<4x1xf32>
    %37 = arith.divf %35, %36 : vector<4x1xf32>
    %38 = vector.broadcast %37 : vector<4x1xf32> to vector<4x32xf32>
    %39 = arith.subf %33, %38 : vector<4x32xf32>
    %40 = arith.mulf %39, %39 : vector<4x32xf32>
    %cst_21 = arith.constant dense<0.000000e+00> : vector<4xf32>
    %41 = vector.multi_reduction <add>, %40, %cst_21 [1] : vector<4x32xf32> to vector<4xf32>
    %42 = vector.shape_cast %41 : vector<4xf32> to vector<4x1xf32>
    %cst_22 = arith.constant 3.200000e+01 : f32
    %43 = vector.broadcast %cst_22 : f32 to vector<4x1xf32>
    %44 = arith.divf %42, %43 : vector<4x1xf32>
    %cst_23 = arith.constant 9.99999974E-6 : f32
    %45 = vector.broadcast %cst_23 : f32 to vector<4x1xf32>
    %46 = arith.addf %44, %45 : vector<4x1xf32>
    %47 = math.rsqrt %46 : vector<4x1xf32>
    %48 = vector.broadcast %47 : vector<4x1xf32> to vector<4x32xf32>
    %49 = arith.mulf %39, %48 : vector<4x32xf32>
    %50 = vector.broadcast %0 : vector<1x32xf32> to vector<4x32xf32>
    %51 = arith.mulf %49, %50 : vector<4x32xf32>
    %52 = vector.broadcast %1 : vector<1x32xf32> to vector<4x32xf32>
    %53 = arith.addf %51, %52 : vector<4x32xf32>
    %54 = arith.truncf %53 : vector<4x32xf32> to vector<4x32xbf16>
    %c0_24 = arith.constant 0 : index
    %c0_25 = arith.constant 0 : index
    %55 = vector.load %arg5[%c0_24, %c0_25] : memref<32x32xbf16, #tpu.memory_space<vmem>>, vector<32x32xbf16>
    %cst_26 = arith.constant dense<0.000000e+00> : vector<4x32xf32>
    %56 = tpu.matmul %54, %55, %cst_26 {dimension_numbers = #tpu.dot_dimension_numbers<[1], [0], [0], [1], [0, 0, 1, 1], [], []>} : vector<4x32xbf16>, vector<32x32xbf16>, vector<4x32xf32> -> vector<4x32xf32>
    %c0_27 = arith.constant 0 : index
    %c0_28 = arith.constant 0 : index
    %57 = vector.load %arg7[%c0_27, %c0_28] : memref<32x4xf32, #tpu.memory_space<vmem>>, vector<32x4xf32>
    %c0_29 = arith.constant 0 : index
    %c0_30 = arith.constant 0 : index
    %58 = vector.load %arg8[%c0_29, %c0_30] : memref<4x32xf32, #tpu.memory_space<vmem>>, vector<4x32xf32>
    %59 = vector.extract_strided_slice %32 {offsets = [0, 0], sizes = [8, 32], strides = [1, 1]} : vector<32x64xf32> to vector<8x32xf32>
    %60 = vector.extract_strided_slice %32 {offsets = [0, 32], sizes = [8, 32], strides = [1, 1]} : vector<32x64xf32> to vector<8x32xf32>
    %61 = vector.extract_strided_slice %56 {offsets = [0, 0], sizes = [1, 32], strides = [1, 1]} : vector<4x32xf32> to vector<1x32xf32>
    %62 = vector.broadcast %61 : vector<1x32xf32> to vector<8x32xf32>
    %63 = arith.mulf %59, %62 : vector<8x32xf32>
    %cst_31 = arith.constant dense<0.000000e+00> : vector<8x4xf32>
    %64 = tpu.matmul %63, %57, %cst_31 {dimension_numbers = #tpu.dot_dimension_numbers<[1], [0], [0], [1], [0, 0, 1, 1], [], []>} : vector<8x32xf32>, vector<32x4xf32>, vector<8x4xf32> -> vector<8x4xf32>
    %cst_32 = arith.constant dense<0xFF800000> : vector<4xf32>
    %65 = vector.multi_reduction <maximumf>, %64, %cst_32 [0] : vector<8x4xf32> to vector<4xf32>
    %66 = vector.shape_cast %65 : vector<4xf32> to vector<1x4xf32>
    %67 = vector.broadcast %66 : vector<1x4xf32> to vector<8x4xf32>
    %68 = arith.subf %64, %67 : vector<8x4xf32>
    %69 = math.exp %68 : vector<8x4xf32>
    %cst_33 = arith.constant dense<0.000000e+00> : vector<4xf32>
    %70 = vector.multi_reduction <add>, %69, %cst_33 [0] : vector<8x4xf32> to vector<4xf32>
    %71 = vector.shape_cast %70 : vector<4xf32> to vector<1x4xf32>
    %72 = tpu.reciprocal %71 {approx = true} : vector<1x4xf32> -> vector<1x4xf32>
    %73 = vector.broadcast %72 : vector<1x4xf32> to vector<8x4xf32>
    %74 = arith.mulf %69, %73 : vector<8x4xf32>
    %75 = arith.truncf %74 : vector<8x4xf32> to vector<8x4xbf16>
    %76 = arith.truncf %60 : vector<8x32xf32> to vector<8x32xbf16>
    %cst_34 = arith.constant dense<0.000000e+00> : vector<4x32xf32>
    %77 = tpu.matmul %75, %76, %cst_34 {dimension_numbers = #tpu.dot_dimension_numbers<[0], [0], [1], [1], [0, 1, 1, 1], [], []>} : vector<8x4xbf16>, vector<8x32xbf16>, vector<4x32xf32> -> vector<4x32xf32>
    %78 = arith.mulf %58, %77 : vector<4x32xf32>
    %cst_35 = arith.constant dense<0.000000e+00> : vector<32xf32>
    %79 = vector.multi_reduction <add>, %78, %cst_35 [0] : vector<4x32xf32> to vector<32xf32>
    %80 = vector.shape_cast %79 : vector<32xf32> to vector<1x32xf32>
    %81 = vector.extract_strided_slice %32 {offsets = [8, 0], sizes = [8, 32], strides = [1, 1]} : vector<32x64xf32> to vector<8x32xf32>
    %82 = vector.extract_strided_slice %32 {offsets = [8, 32], sizes = [8, 32], strides = [1, 1]} : vector<32x64xf32> to vector<8x32xf32>
    %83 = vector.extract_strided_slice %56 {offsets = [1, 0], sizes = [1, 32], strides = [1, 1]} : vector<4x32xf32> to vector<1x32xf32>
    %84 = vector.broadcast %83 : vector<1x32xf32> to vector<8x32xf32>
    %85 = arith.mulf %81, %84 : vector<8x32xf32>
    %cst_36 = arith.constant dense<0.000000e+00> : vector<8x4xf32>
    %86 = tpu.matmul %85, %57, %cst_36 {dimension_numbers = #tpu.dot_dimension_numbers<[1], [0], [0], [1], [0, 0, 1, 1], [], []>} : vector<8x32xf32>, vector<32x4xf32>, vector<8x4xf32> -> vector<8x4xf32>
    %cst_37 = arith.constant dense<0xFF800000> : vector<4xf32>
    %87 = vector.multi_reduction <maximumf>, %86, %cst_37 [0] : vector<8x4xf32> to vector<4xf32>
    %88 = vector.shape_cast %87 : vector<4xf32> to vector<1x4xf32>
    %89 = vector.broadcast %88 : vector<1x4xf32> to vector<8x4xf32>
    %90 = arith.subf %86, %89 : vector<8x4xf32>
    %91 = math.exp %90 : vector<8x4xf32>
    %cst_38 = arith.constant dense<0.000000e+00> : vector<4xf32>
    %92 = vector.multi_reduction <add>, %91, %cst_38 [0] : vector<8x4xf32> to vector<4xf32>
    %93 = vector.shape_cast %92 : vector<4xf32> to vector<1x4xf32>
    %94 = tpu.reciprocal %93 {approx = true} : vector<1x4xf32> -> vector<1x4xf32>
    %95 = vector.broadcast %94 : vector<1x4xf32> to vector<8x4xf32>
    %96 = arith.mulf %91, %95 : vector<8x4xf32>
    %97 = arith.truncf %96 : vector<8x4xf32> to vector<8x4xbf16>
    %98 = arith.truncf %82 : vector<8x32xf32> to vector<8x32xbf16>
    %cst_39 = arith.constant dense<0.000000e+00> : vector<4x32xf32>
    %99 = tpu.matmul %97, %98, %cst_39 {dimension_numbers = #tpu.dot_dimension_numbers<[0], [0], [1], [1], [0, 1, 1, 1], [], []>} : vector<8x4xbf16>, vector<8x32xbf16>, vector<4x32xf32> -> vector<4x32xf32>
    %100 = arith.mulf %58, %99 : vector<4x32xf32>
    %cst_40 = arith.constant dense<0.000000e+00> : vector<32xf32>
    %101 = vector.multi_reduction <add>, %100, %cst_40 [0] : vector<4x32xf32> to vector<32xf32>
    %102 = vector.shape_cast %101 : vector<32xf32> to vector<1x32xf32>
    %103 = vector.extract_strided_slice %32 {offsets = [16, 0], sizes = [8, 32], strides = [1, 1]} : vector<32x64xf32> to vector<8x32xf32>
    %104 = vector.extract_strided_slice %32 {offsets = [16, 32], sizes = [8, 32], strides = [1, 1]} : vector<32x64xf32> to vector<8x32xf32>
    %105 = vector.extract_strided_slice %56 {offsets = [2, 0], sizes = [1, 32], strides = [1, 1]} : vector<4x32xf32> to vector<1x32xf32>
    %106 = vector.broadcast %105 : vector<1x32xf32> to vector<8x32xf32>
    %107 = arith.mulf %103, %106 : vector<8x32xf32>
    %cst_41 = arith.constant dense<0.000000e+00> : vector<8x4xf32>
    %108 = tpu.matmul %107, %57, %cst_41 {dimension_numbers = #tpu.dot_dimension_numbers<[1], [0], [0], [1], [0, 0, 1, 1], [], []>} : vector<8x32xf32>, vector<32x4xf32>, vector<8x4xf32> -> vector<8x4xf32>
    %cst_42 = arith.constant dense<0xFF800000> : vector<4xf32>
    %109 = vector.multi_reduction <maximumf>, %108, %cst_42 [0] : vector<8x4xf32> to vector<4xf32>
    %110 = vector.shape_cast %109 : vector<4xf32> to vector<1x4xf32>
    %111 = vector.broadcast %110 : vector<1x4xf32> to vector<8x4xf32>
    %112 = arith.subf %108, %111 : vector<8x4xf32>
    %113 = math.exp %112 : vector<8x4xf32>
    %cst_43 = arith.constant dense<0.000000e+00> : vector<4xf32>
    %114 = vector.multi_reduction <add>, %113, %cst_43 [0] : vector<8x4xf32> to vector<4xf32>
    %115 = vector.shape_cast %114 : vector<4xf32> to vector<1x4xf32>
    %116 = tpu.reciprocal %115 {approx = true} : vector<1x4xf32> -> vector<1x4xf32>
    %117 = vector.broadcast %116 : vector<1x4xf32> to vector<8x4xf32>
    %118 = arith.mulf %113, %117 : vector<8x4xf32>
    %119 = arith.truncf %118 : vector<8x4xf32> to vector<8x4xbf16>
    %120 = arith.truncf %104 : vector<8x32xf32> to vector<8x32xbf16>
    %cst_44 = arith.constant dense<0.000000e+00> : vector<4x32xf32>
    %121 = tpu.matmul %119, %120, %cst_44 {dimension_numbers = #tpu.dot_dimension_numbers<[0], [0], [1], [1], [0, 1, 1, 1], [], []>} : vector<8x4xbf16>, vector<8x32xbf16>, vector<4x32xf32> -> vector<4x32xf32>
    %122 = arith.mulf %58, %121 : vector<4x32xf32>
    %cst_45 = arith.constant dense<0.000000e+00> : vector<32xf32>
    %123 = vector.multi_reduction <add>, %122, %cst_45 [0] : vector<4x32xf32> to vector<32xf32>
    %124 = vector.shape_cast %123 : vector<32xf32> to vector<1x32xf32>
    %125 = vector.extract_strided_slice %32 {offsets = [24, 0], sizes = [8, 32], strides = [1, 1]} : vector<32x64xf32> to vector<8x32xf32>
    %126 = vector.extract_strided_slice %32 {offsets = [24, 32], sizes = [8, 32], strides = [1, 1]} : vector<32x64xf32> to vector<8x32xf32>
    %127 = vector.extract_strided_slice %56 {offsets = [3, 0], sizes = [1, 32], strides = [1, 1]} : vector<4x32xf32> to vector<1x32xf32>
    %128 = vector.broadcast %127 : vector<1x32xf32> to vector<8x32xf32>
    %129 = arith.mulf %125, %128 : vector<8x32xf32>
    %cst_46 = arith.constant dense<0.000000e+00> : vector<8x4xf32>
    %130 = tpu.matmul %129, %57, %cst_46 {dimension_numbers = #tpu.dot_dimension_numbers<[1], [0], [0], [1], [0, 0, 1, 1], [], []>} : vector<8x32xf32>, vector<32x4xf32>, vector<8x4xf32> -> vector<8x4xf32>
    %cst_47 = arith.constant dense<0xFF800000> : vector<4xf32>
    %131 = vector.multi_reduction <maximumf>, %130, %cst_47 [0] : vector<8x4xf32> to vector<4xf32>
    %132 = vector.shape_cast %131 : vector<4xf32> to vector<1x4xf32>
    %133 = vector.broadcast %132 : vector<1x4xf32> to vector<8x4xf32>
    %134 = arith.subf %130, %133 : vector<8x4xf32>
    %135 = math.exp %134 : vector<8x4xf32>
    %cst_48 = arith.constant dense<0.000000e+00> : vector<4xf32>
    %136 = vector.multi_reduction <add>, %135, %cst_48 [0] : vector<8x4xf32> to vector<4xf32>
    %137 = vector.shape_cast %136 : vector<4xf32> to vector<1x4xf32>
    %138 = tpu.reciprocal %137 {approx = true} : vector<1x4xf32> -> vector<1x4xf32>
    %139 = vector.broadcast %138 : vector<1x4xf32> to vector<8x4xf32>
    %140 = arith.mulf %135, %139 : vector<8x4xf32>
    %141 = arith.truncf %140 : vector<8x4xf32> to vector<8x4xbf16>
    %142 = arith.truncf %126 : vector<8x32xf32> to vector<8x32xbf16>
    %cst_49 = arith.constant dense<0.000000e+00> : vector<4x32xf32>
    %143 = tpu.matmul %141, %142, %cst_49 {dimension_numbers = #tpu.dot_dimension_numbers<[0], [0], [1], [1], [0, 1, 1, 1], [], []>} : vector<8x4xbf16>, vector<8x32xbf16>, vector<4x32xf32> -> vector<4x32xf32>
    %144 = arith.mulf %58, %143 : vector<4x32xf32>
    %cst_50 = arith.constant dense<0.000000e+00> : vector<32xf32>
    %145 = vector.multi_reduction <add>, %144, %cst_50 [0] : vector<4x32xf32> to vector<32xf32>
    %146 = vector.shape_cast %145 : vector<32xf32> to vector<1x32xf32>
    %147 = tpu.concatenate %80, %102, %124, %146 in 0 : vector<1x32xf32>, vector<1x32xf32>, vector<1x32xf32>, vector<1x32xf32> -> vector<4x32xf32>
    %c0_51 = arith.constant 0 : index
    %c0_52 = arith.constant 0 : index
    %148 = vector.load %arg10[%c0_51, %c0_52] : memref<4x32xf32, #tpu.memory_space<vmem>>, vector<4x32xf32>
    tpu.vector_store %arg10[%c0_51, %c0_52], %147 {strides = array<i32>} : memref<4x32xf32, #tpu.memory_space<vmem>>, vector<4x32xf32>,
    return
  }
  func.func @transform_0(%arg0: i32) -> (i32, i32) {
    %c0_i32 = arith.constant 0 : i32
    %c0_i32_0 = arith.constant 0 : i32
    return %arg0, %c0_i32 : i32, i32
  }
  func.func @transform_1(%arg0: i32) -> (i32, i32) {
    %c0_i32 = arith.constant 0 : i32
    %c0_i32_0 = arith.constant 0 : i32
    return %arg0, %c0_i32 : i32, i32
  }
  func.func @transform_2(%arg0: i32) -> (i32, i32) {
    %c0_i32 = arith.constant 0 : i32
    %c0_i32_0 = arith.constant 0 : i32
    %c0_i32_1 = arith.constant 0 : i32
    return %c0_i32, %c0_i32_0 : i32, i32
  }
  func.func @transform_3(%arg0: i32) -> (i32, i32) {
    %c0_i32 = arith.constant 0 : i32
    %c0_i32_0 = arith.constant 0 : i32
    %c0_i32_1 = arith.constant 0 : i32
    return %c0_i32, %c0_i32_0 : i32, i32
  }
  func.func @transform_4(%arg0: i32) -> (i32, i32) {
    %c0_i32 = arith.constant 0 : i32
    %c0_i32_0 = arith.constant 0 : i32
    %c0_i32_1 = arith.constant 0 : i32
    return %c0_i32, %c0_i32_0 : i32, i32
  }
  func.func @transform_5(%arg0: i32) -> (i32, i32) {
    %c0_i32 = arith.constant 0 : i32
    %c0_i32_0 = arith.constant 0 : i32
    %c0_i32_1 = arith.constant 0 : i32
    return %c0_i32, %c0_i32_0 : i32, i32
  }
  func.func @transform_6(%arg0: i32) -> (i32, i32) {
    %c0_i32 = arith.constant 0 : i32
    %c0_i32_0 = arith.constant 0 : i32
    %c0_i32_1 = arith.constant 0 : i32
    return %c0_i32, %c0_i32_0 : i32, i32
  }
  func.func @transform_7(%arg0: i32) -> (i32, i32) {
    %c0_i32 = arith.constant 0 : i32
    %c0_i32_0 = arith.constant 0 : i32
    %c0_i32_1 = arith.constant 0 : i32
    return %c0_i32, %c0_i32_0 : i32, i32
  }
  func.func @transform_8(%arg0: i32) -> (i32, i32) {
    %c0_i32 = arith.constant 0 : i32
    %c0_i32_0 = arith.constant 0 : i32
    %c0_i32_1 = arith.constant 0 : i32
    return %c0_i32, %c0_i32_0 : i32, i32
  }
  func.func @transform_9(%arg0: i32) -> (i32, i32) {
    %c0_i32 = arith.constant 0 : i32
    %c0_i32_0 = arith.constant 0 : i32
    return %arg0, %c0_i32 : i32, i32
  }
  func.func @transform_10(%arg0: i32) -> (i32, i32) {
    %c0_i32 = arith.constant 0 : i32
    %c0_i32_0 = arith.constant 0 : i32
    return %arg0, %c0_i32 : i32, i32
  }
}

module attributes {stable_mosaic.version = 11 : i64} {
  func.func @_cls_mlp_patch_kernel(%arg0: i32, %arg1: memref<4x32xf32, #tpu.memory_space<vmem>>, %arg2: memref<4x32xf32, #tpu.memory_space<vmem>>, %arg3: memref<32x32xbf16, #tpu.memory_space<vmem>>, %arg4: memref<1x32xf32, #tpu.memory_space<vmem>>, %arg5: memref<1x32xf32, #tpu.memory_space<vmem>>, %arg6: memref<1x32xf32, #tpu.memory_space<vmem>>, %arg7: memref<32x128xbf16, #tpu.memory_space<vmem>>, %arg8: memref<1x128xf32, #tpu.memory_space<vmem>>, %arg9: memref<1x128xf32, #tpu.memory_space<vmem>>, %arg10: memref<1x128xf32, #tpu.memory_space<vmem>>, %arg11: memref<128x32xbf16, #tpu.memory_space<vmem>>, %arg12: memref<1x32xf32, #tpu.memory_space<vmem>>, %arg13: memref<4x8x32xf32, #tpu.memory_space<vmem>>, %arg14: memref<4x8x32xf32, #tpu.memory_space<vmem>>) attributes {dimension_semantics = [#tpu.dimension_semantics<arbitrary>], iteration_bounds = array<i64: 1>, scalar_prefetch = 0 : i64, scratch_operands = 0 : i64, tpu.core_type = #tpu.core_type<tc>, window_params = [{pipeline_mode = #tpu.pipeline_mode<synchronous>, transform_indices = @transform_0, window_bounds = array<i64: 4, 32>}, {pipeline_mode = #tpu.pipeline_mode<synchronous>, transform_indices = @transform_1, window_bounds = array<i64: 4, 32>}, {pipeline_mode = #tpu.pipeline_mode<synchronous>, transform_indices = @transform_2, window_bounds = array<i64: 32, 32>}, {pipeline_mode = #tpu.pipeline_mode<synchronous>, transform_indices = @transform_3, window_bounds = array<i64: 1, 32>}, {pipeline_mode = #tpu.pipeline_mode<synchronous>, transform_indices = @transform_4, window_bounds = array<i64: 1, 32>}, {pipeline_mode = #tpu.pipeline_mode<synchronous>, transform_indices = @transform_5, window_bounds = array<i64: 1, 32>}, {pipeline_mode = #tpu.pipeline_mode<synchronous>, transform_indices = @transform_6, window_bounds = array<i64: 32, 128>}, {pipeline_mode = #tpu.pipeline_mode<synchronous>, transform_indices = @transform_7, window_bounds = array<i64: 1, 128>}, {pipeline_mode = #tpu.pipeline_mode<synchronous>, transform_indices = @transform_8, window_bounds = array<i64: 1, 128>}, {pipeline_mode = #tpu.pipeline_mode<synchronous>, transform_indices = @transform_9, window_bounds = array<i64: 1, 128>}, {pipeline_mode = #tpu.pipeline_mode<synchronous>, transform_indices = @transform_10, window_bounds = array<i64: 128, 32>}, {pipeline_mode = #tpu.pipeline_mode<synchronous>, transform_indices = @transform_11, window_bounds = array<i64: 1, 32>}, {pipeline_mode = #tpu.pipeline_mode<synchronous>, transform_indices = @transform_12, window_bounds = array<i64: 4, 8, 32>}, {pipeline_mode = #tpu.pipeline_mode<synchronous>, transform_indices = @transform_13, window_bounds = array<i64: 4, 8, 32>}]} {
    %c0 = arith.constant 0 : index
    %c0_0 = arith.constant 0 : index
    %0 = vector.load %arg1[%c0, %c0_0] : memref<4x32xf32, #tpu.memory_space<vmem>>, vector<4x32xf32>
    %1 = arith.truncf %0 : vector<4x32xf32> to vector<4x32xbf16>
    %c0_1 = arith.constant 0 : index
    %c0_2 = arith.constant 0 : index
    %2 = vector.load %arg3[%c0_1, %c0_2] : memref<32x32xbf16, #tpu.memory_space<vmem>>, vector<32x32xbf16>
    %cst = arith.constant dense<0.000000e+00> : vector<4x32xf32>
    %3 = tpu.matmul %1, %2, %cst {dimension_numbers = #tpu.dot_dimension_numbers<[1], [0], [0], [1], [0, 0, 1, 1], [], []>} : vector<4x32xbf16>, vector<32x32xbf16>, vector<4x32xf32> -> vector<4x32xf32>
    %c0_3 = arith.constant 0 : index
    %c0_4 = arith.constant 0 : index
    %4 = vector.load %arg4[%c0_3, %c0_4] : memref<1x32xf32, #tpu.memory_space<vmem>>, vector<1x32xf32>
    %5 = vector.broadcast %4 : vector<1x32xf32> to vector<4x32xf32>
    %6 = arith.addf %3, %5 : vector<4x32xf32>
    %c0_5 = arith.constant 0 : index
    %c0_6 = arith.constant 0 : index
    %7 = vector.load %arg2[%c0_5, %c0_6] : memref<4x32xf32, #tpu.memory_space<vmem>>, vector<4x32xf32>
    %c0_7 = arith.constant 0 : index
    %c0_8 = arith.constant 0 : index
    %8 = vector.load %arg5[%c0_7, %c0_8] : memref<1x32xf32, #tpu.memory_space<vmem>>, vector<1x32xf32>
    %9 = vector.broadcast %8 : vector<1x32xf32> to vector<4x32xf32>
    %10 = arith.mulf %9, %6 : vector<4x32xf32>
    %11 = arith.addf %7, %10 : vector<4x32xf32>
    %12 = arith.truncf %11 : vector<4x32xf32> to vector<4x32xbf16>
    %c0_9 = arith.constant 0 : index
    %c0_10 = arith.constant 0 : index
    %13 = vector.load %arg7[%c0_9, %c0_10] : memref<32x128xbf16, #tpu.memory_space<vmem>>, vector<32x128xbf16>
    %cst_11 = arith.constant dense<0.000000e+00> : vector<4x128xf32>
    %14 = tpu.matmul %12, %13, %cst_11 {dimension_numbers = #tpu.dot_dimension_numbers<[1], [0], [0], [1], [0, 0, 1, 1], [], []>} : vector<4x32xbf16>, vector<32x128xbf16>, vector<4x128xf32> -> vector<4x128xf32>
    %c0_12 = arith.constant 0 : index
    %c0_13 = arith.constant 0 : index
    %15 = vector.load %arg8[%c0_12, %c0_13] : memref<1x128xf32, #tpu.memory_space<vmem>>, vector<1x128xf32>
    %16 = vector.broadcast %15 : vector<1x128xf32> to vector<4x128xf32>
    %17 = arith.addf %14, %16 : vector<4x128xf32>
    %cst_14 = arith.constant 5.000000e-01 : f32
    %18 = vector.broadcast %cst_14 : f32 to vector<4x128xf32>
    %19 = arith.mulf %18, %17 : vector<4x128xf32>
    %cst_15 = arith.constant 0.707106769 : f32
    %20 = vector.broadcast %cst_15 : f32 to vector<4x128xf32>
    %21 = arith.mulf %17, %20 : vector<4x128xf32>
    %cst_16 = arith.constant 0.000000e+00 : f32
    %22 = vector.broadcast %cst_16 : f32 to vector<4x128xf32>
    %23 = arith.cmpf oge, %21, %22 : vector<4x128xf32>
    %cst_17 = arith.constant 1.000000e+00 : f32
    %cst_18 = arith.constant -1.000000e+00 : f32
    %24 = vector.broadcast %cst_17 : f32 to vector<4x128xf32>
    %25 = vector.broadcast %cst_18 : f32 to vector<4x128xf32>
    %26 = arith.select %23, %24, %25 : vector<4x128xi1>, vector<4x128xf32>
    %27 = math.absf %21 : vector<4x128xf32>
    %cst_19 = arith.constant 0.327591091 : f32
    %28 = vector.broadcast %cst_19 : f32 to vector<4x128xf32>
    %29 = arith.mulf %28, %27 : vector<4x128xf32>
    %cst_20 = arith.constant 1.000000e+00 : f32
    %30 = vector.broadcast %cst_20 : f32 to vector<4x128xf32>
    %31 = arith.addf %30, %29 : vector<4x128xf32>
    %cst_21 = arith.constant 1.000000e+00 : f32
    %32 = vector.broadcast %cst_21 : f32 to vector<4x128xf32>
    %33 = arith.divf %32, %31 : vector<4x128xf32>
    %cst_22 = arith.constant 1.06140542 : f32
    %34 = vector.broadcast %cst_22 : f32 to vector<4x128xf32>
    %35 = arith.mulf %34, %33 : vector<4x128xf32>
    %cst_23 = arith.constant -1.45315206 : f32
    %36 = vector.broadcast %cst_23 : f32 to vector<4x128xf32>
    %37 = arith.addf %35, %36 : vector<4x128xf32>
    %38 = arith.mulf %37, %33 : vector<4x128xf32>
    %cst_24 = arith.constant 1.42141378 : f32
    %39 = vector.broadcast %cst_24 : f32 to vector<4x128xf32>
    %40 = arith.addf %38, %39 : vector<4x128xf32>
    %41 = arith.mulf %40, %33 : vector<4x128xf32>
    %cst_25 = arith.constant -0.284496725 : f32
    %42 = vector.broadcast %cst_25 : f32 to vector<4x128xf32>
    %43 = arith.addf %41, %42 : vector<4x128xf32>
    %44 = arith.mulf %43, %33 : vector<4x128xf32>
    %cst_26 = arith.constant 0.254829586 : f32
    %45 = vector.broadcast %cst_26 : f32 to vector<4x128xf32>
    %46 = arith.addf %44, %45 : vector<4x128xf32>
    %47 = arith.mulf %46, %33 : vector<4x128xf32>
    %cst_27 = arith.constant 0.000000e+00 : f32
    %48 = vector.broadcast %cst_27 : f32 to vector<4x128xf32>
    %49 = arith.subf %48, %27 : vector<4x128xf32>
    %50 = arith.mulf %49, %27 : vector<4x128xf32>
    %51 = math.exp %50 : vector<4x128xf32>
    %52 = arith.mulf %47, %51 : vector<4x128xf32>
    %cst_28 = arith.constant 1.000000e+00 : f32
    %53 = vector.broadcast %cst_28 : f32 to vector<4x128xf32>
    %54 = arith.subf %53, %52 : vector<4x128xf32>
    %55 = arith.mulf %26, %54 : vector<4x128xf32>
    %cst_29 = arith.constant 1.000000e+00 : f32
    %56 = vector.broadcast %cst_29 : f32 to vector<4x128xf32>
    %57 = arith.addf %56, %55 : vector<4x128xf32>
    %58 = arith.mulf %19, %57 : vector<4x128xf32>
    %c0_30 = arith.constant 0 : index
    %c0_31 = arith.constant 0 : index
    %59 = vector.load %arg9[%c0_30, %c0_31] : memref<1x128xf32, #tpu.memory_space<vmem>>, vector<1x128xf32>
    %c0_32 = arith.constant 0 : index
    %c0_33 = arith.constant 0 : index
    %60 = vector.load %arg10[%c0_32, %c0_33] : memref<1x128xf32, #tpu.memory_space<vmem>>, vector<1x128xf32>
    %cst_34 = arith.constant dense<0.000000e+00> : vector<4xf32>
    %61 = vector.multi_reduction <add>, %58, %cst_34 [1] : vector<4x128xf32> to vector<4xf32>
    %62 = vector.shape_cast %61 : vector<4xf32> to vector<4x1xf32>
    %cst_35 = arith.constant 1.280000e+02 : f32
    %63 = vector.broadcast %cst_35 : f32 to vector<4x1xf32>
    %64 = arith.divf %62, %63 : vector<4x1xf32>
    %65 = vector.broadcast %64 : vector<4x1xf32> to vector<4x128xf32>
    %66 = arith.subf %58, %65 : vector<4x128xf32>
    %67 = arith.mulf %66, %66 : vector<4x128xf32>
    %cst_36 = arith.constant dense<0.000000e+00> : vector<4xf32>
    %68 = vector.multi_reduction <add>, %67, %cst_36 [1] : vector<4x128xf32> to vector<4xf32>
    %69 = vector.shape_cast %68 : vector<4xf32> to vector<4x1xf32>
    %cst_37 = arith.constant 1.280000e+02 : f32
    %70 = vector.broadcast %cst_37 : f32 to vector<4x1xf32>
    %71 = arith.divf %69, %70 : vector<4x1xf32>
    %cst_38 = arith.constant 9.99999974E-6 : f32
    %72 = vector.broadcast %cst_38 : f32 to vector<4x1xf32>
    %73 = arith.addf %71, %72 : vector<4x1xf32>
    %74 = math.rsqrt %73 : vector<4x1xf32>
    %75 = vector.broadcast %74 : vector<4x1xf32> to vector<4x128xf32>
    %76 = arith.mulf %66, %75 : vector<4x128xf32>
    %77 = vector.broadcast %59 : vector<1x128xf32> to vector<4x128xf32>
    %78 = arith.mulf %76, %77 : vector<4x128xf32>
    %79 = vector.broadcast %60 : vector<1x128xf32> to vector<4x128xf32>
    %80 = arith.addf %78, %79 : vector<4x128xf32>
    %81 = arith.truncf %80 : vector<4x128xf32> to vector<4x128xbf16>
    %c0_39 = arith.constant 0 : index
    %c0_40 = arith.constant 0 : index
    %82 = vector.load %arg11[%c0_39, %c0_40] : memref<128x32xbf16, #tpu.memory_space<vmem>>, vector<128x32xbf16>
    %cst_41 = arith.constant dense<0.000000e+00> : vector<4x32xf32>
    %83 = tpu.matmul %81, %82, %cst_41 {dimension_numbers = #tpu.dot_dimension_numbers<[1], [0], [0], [1], [0, 0, 1, 1], [], []>} : vector<4x128xbf16>, vector<128x32xbf16>, vector<4x32xf32> -> vector<4x32xf32>
    %c0_42 = arith.constant 0 : index
    %c0_43 = arith.constant 0 : index
    %84 = vector.load %arg12[%c0_42, %c0_43] : memref<1x32xf32, #tpu.memory_space<vmem>>, vector<1x32xf32>
    %85 = vector.broadcast %84 : vector<1x32xf32> to vector<4x32xf32>
    %86 = arith.addf %83, %85 : vector<4x32xf32>
    %c0_44 = arith.constant 0 : index
    %c0_45 = arith.constant 0 : index
    %87 = vector.load %arg6[%c0_44, %c0_45] : memref<1x32xf32, #tpu.memory_space<vmem>>, vector<1x32xf32>
    %88 = vector.broadcast %87 : vector<1x32xf32> to vector<4x32xf32>
    %89 = arith.mulf %88, %86 : vector<4x32xf32>
    %90 = arith.addf %11, %89 : vector<4x32xf32>
    %c0_46 = arith.constant 0 : index
    %c0_47 = arith.constant 0 : index
    %c0_48 = arith.constant 0 : index
    %91 = vector.load %arg13[%c0_46, %c0_47, %c0_48] : memref<4x8x32xf32, #tpu.memory_space<vmem>>, vector<4x8x32xf32>
    %92 = tpu.iota {dimensions = array<i32: 1>} : vector<1x8x1xi32>
    %c0_i32 = arith.constant 0 : i32
    %93 = vector.broadcast %c0_i32 : i32 to vector<1x8x1xi32>
    %94 = arith.cmpi eq, %92, %93 : vector<1x8x1xi32>
    %95 = vector.shape_cast %90 : vector<4x32xf32> to vector<4x1x32xf32>
    %96 = vector.shape_cast %94 : vector<1x8x1xi1> to vector<1x8x1xi1>
    %97 = vector.broadcast %96 : vector<1x8x1xi1> to vector<4x8x32xi1>
    %98 = vector.shape_cast %95 : vector<4x1x32xf32> to vector<4x1x32xf32>
    %99 = vector.broadcast %98 : vector<4x1x32xf32> to vector<4x8x32xf32>
    %100 = arith.select %97, %99, %91 : vector<4x8x32xi1>, vector<4x8x32xf32>
    %c0_49 = arith.constant 0 : index
    %c0_50 = arith.constant 0 : index
    %c0_51 = arith.constant 0 : index
    %101 = vector.load %arg14[%c0_49, %c0_50, %c0_51] : memref<4x8x32xf32, #tpu.memory_space<vmem>>, vector<4x8x32xf32>
    tpu.vector_store %arg14[%c0_49, %c0_50, %c0_51], %100 {strides = array<i32>} : memref<4x8x32xf32, #tpu.memory_space<vmem>>, vector<4x8x32xf32>,
    return
  }
  func.func @transform_0(%arg0: i32) -> (i32, i32) {
    %c0_i32 = arith.constant 0 : i32
    %c0_i32_0 = arith.constant 0 : i32
    %c0_i32_1 = arith.constant 0 : i32
    return %c0_i32, %c0_i32_0 : i32, i32
  }
  func.func @transform_1(%arg0: i32) -> (i32, i32) {
    %c0_i32 = arith.constant 0 : i32
    %c0_i32_0 = arith.constant 0 : i32
    %c0_i32_1 = arith.constant 0 : i32
    return %c0_i32, %c0_i32_0 : i32, i32
  }
  func.func @transform_2(%arg0: i32) -> (i32, i32) {
    %c0_i32 = arith.constant 0 : i32
    %c0_i32_0 = arith.constant 0 : i32
    %c0_i32_1 = arith.constant 0 : i32
    return %c0_i32, %c0_i32_0 : i32, i32
  }
  func.func @transform_3(%arg0: i32) -> (i32, i32) {
    %c0_i32 = arith.constant 0 : i32
    %c0_i32_0 = arith.constant 0 : i32
    %c0_i32_1 = arith.constant 0 : i32
    return %c0_i32, %c0_i32_0 : i32, i32
  }
  func.func @transform_4(%arg0: i32) -> (i32, i32) {
    %c0_i32 = arith.constant 0 : i32
    %c0_i32_0 = arith.constant 0 : i32
    %c0_i32_1 = arith.constant 0 : i32
    return %c0_i32, %c0_i32_0 : i32, i32
  }
  func.func @transform_5(%arg0: i32) -> (i32, i32) {
    %c0_i32 = arith.constant 0 : i32
    %c0_i32_0 = arith.constant 0 : i32
    %c0_i32_1 = arith.constant 0 : i32
    return %c0_i32, %c0_i32_0 : i32, i32
  }
  func.func @transform_6(%arg0: i32) -> (i32, i32) {
    %c0_i32 = arith.constant 0 : i32
    %c0_i32_0 = arith.constant 0 : i32
    %c0_i32_1 = arith.constant 0 : i32
    return %c0_i32, %c0_i32_0 : i32, i32
  }
  func.func @transform_7(%arg0: i32) -> (i32, i32) {
    %c0_i32 = arith.constant 0 : i32
    %c0_i32_0 = arith.constant 0 : i32
    %c0_i32_1 = arith.constant 0 : i32
    return %c0_i32, %c0_i32_0 : i32, i32
  }
  func.func @transform_8(%arg0: i32) -> (i32, i32) {
    %c0_i32 = arith.constant 0 : i32
    %c0_i32_0 = arith.constant 0 : i32
    %c0_i32_1 = arith.constant 0 : i32
    return %c0_i32, %c0_i32_0 : i32, i32
  }
  func.func @transform_9(%arg0: i32) -> (i32, i32) {
    %c0_i32 = arith.constant 0 : i32
    %c0_i32_0 = arith.constant 0 : i32
    %c0_i32_1 = arith.constant 0 : i32
    return %c0_i32, %c0_i32_0 : i32, i32
  }
  func.func @transform_10(%arg0: i32) -> (i32, i32) {
    %c0_i32 = arith.constant 0 : i32
    %c0_i32_0 = arith.constant 0 : i32
    %c0_i32_1 = arith.constant 0 : i32
    return %c0_i32, %c0_i32_0 : i32, i32
  }
  func.func @transform_11(%arg0: i32) -> (i32, i32) {
    %c0_i32 = arith.constant 0 : i32
    %c0_i32_0 = arith.constant 0 : i32
    %c0_i32_1 = arith.constant 0 : i32
    return %c0_i32, %c0_i32_0 : i32, i32
  }
  func.func @transform_12(%arg0: i32) -> (i32, i32, i32) {
    %c0_i32 = arith.constant 0 : i32
    %c0_i32_0 = arith.constant 0 : i32
    %c0_i32_1 = arith.constant 0 : i32
    %c0_i32_2 = arith.constant 0 : i32
    return %c0_i32, %c0_i32_0, %c0_i32_1 : i32, i32, i32
  }
  func.func @transform_13(%arg0: i32) -> (i32, i32, i32) {
    %c0_i32 = arith.constant 0 : i32
    %c0_i32_0 = arith.constant 0 : i32
    %c0_i32_1 = arith.constant 0 : i32
    %c0_i32_2 = arith.constant 0 : i32
    return %c0_i32, %c0_i32_0, %c0_i32_1 : i32, i32, i32
  }
}

</mosaic_0001>

<bundles_post_ra>
// kernel: _lambda_.3
= control target key start
LH: loop header
LB: loop body
LE: loop exit
PB: predicated region body
PF: predicated region fallthrough
CT: control target
= control target key end

     0   :  { %18 = vsyncpa [#allocation3], 0  ;;  %s811_s0 = inlined_call_operand.vmem [shape: f32[4,32], index: 0, kind: input, shape index: {}]   ;;  %s812_s1 = inlined_call_operand.vmem [shape: f32[4,32], index: 1, kind: input, shape index: {}]   ;;  %s813_s2 = inlined_call_operand.vmem [shape: bf16[32,32], index: 2, kind: input, shape index: {}]   ;;  %s814_s3 = inlined_call_operand.vmem [shape: f32[1,32], index: 3, kind: input, shape index: {}]   ;;  %s815_s4 = inlined_call_operand.vmem [shape: f32[1,32], index: 4, kind: input, shape index: {}, may-alias: {4,5}]   ;;  %s816_s5 = inlined_call_operand.vmem [shape: f32[1,32], index: 5, kind: input, shape index: {}, may-alias: {4,5}]   ;;  %s817_s6 = inlined_call_operand.vmem [shape: bf16[32,128], index: 6, kind: input, shape index: {}]   ;;  %s818_s7 = inlined_call_operand.vmem [shape: f32[1,128], index: 7, kind: input, shape index: {}]   ;;  %s819_s8 = inlined_call_operand.vmem [shape: f32[1,128], index: 8, kind: input, shape index: {}]   ;;  %s820_s9 = inlined_call_operand.vmem [shape: f32[1,128], index: 9, kind: input, shape index: {}]   ;;  %s821_s10 = inlined_call_operand.vmem [shape: bf16[128,32], index: 10, kind: input, shape index: {}]   ;;  %s822_s11 = inlined_call_operand.vmem [shape: f32[1,32], index: 11, kind: input, shape index: {}]   ;;  %s823_s12 = inlined_call_operand.hbm [shape: f32[4,8,32], index: 12, kind: input, shape index: {}, may-alias: {12,13}]   ;;  %s824_s13 = inlined_call_operand.hbm [shape: f32[4,8,32], index: 13, kind: output, shape index: {}, may-alias: {12,13}]  }
   0x1   :  { %19 = vsyncpa [#allocation4], 0  ;;  %s610_s25 = smov [#allocation2]   ;;  %s562_s29 = scalar_lea.hbm %s823_s12, 512 }
   0x2   :  { %s49_s26 = sshll.u32 %s610_s25, 4  ;;  %p563_p0 = scmp.ne.s32.totalorder %s823_s12, %s562_s29  ;;  %s50_s26 = int_to_ptr.vmem [resolvable:$true] %s49_s26 }
   0x3   :  { %p566_p1 = scmp.lt.u32.totalorder %s562_s29, %s823_s12 }
   0x5   :  { %p568_p2 = pnand %p566_p1, %p563_p0 }
   0x7   :  { %571 = shalt.err (!%p568_p2)
}
   0x8   :  { %s572_s17 = scalar_lea.vmem %s50_s26, 512  ;;  %p577_p4 = scmp.lt.s32.totalorder %s50_s26, %s50_s26 }
   0x9   :  { %p573_p3 = scmp.ne.s32.totalorder %s50_s26, %s572_s17  ;;  %p578_p5 = scmp.lt.s32.totalorder %s572_s17, %s572_s17 }
   0xb   :  { %p579_p6 = por %p578_p5, %p577_p4 }
   0xd   :  { %p580_p7 = pnand %p579_p6, %p573_p3 }
   0xf   :  { %583 = shalt.err (!%p580_p7)
}
  0x10   :  { %s611_s18 = smov 128   ;;  %s612_s19 = smov 8  }
  0x11   :  { %55 = dma.hbm_to_vmem [thread:$0]  %s823_s12, 512, %s50_s26, [#allocation3], %s611_s18, %s611_s18, %s612_s19  }
  0x12   :  { %606 = dma.done.wait [#allocation3], 512  }
  0x13   :  { %607 = vsyncadd [#allocation3], 4294966784  ;;  %v613_v0 = vmov 0.0   ;;  %vm614_vm0 = vmmov 0   ;;  %v544_v1 = vld [vmem:[%s813_s2] sm:$0xff]   ;;  %v545_v2 = vld [vmem:[%s813_s2 + $0x8] sm:$0xff]  }
  0x14   :  { %500 = vmatprep.subr.bf16.mxu1 %v613_v0  ;;  %504 = vmatprep.mubr.msk.bf16.mxu1 %vm614_vm0, %v613_v0  ;;  %v60_v3 = vld [vmem:[%s811_s0] sm:$0xf]  ;;  %vm85_vm1 = vcmask 261120   ;;  %v547_v6 = vld [vmem:[%s817_s6 + $0x8] sm:$0xff]   ;;  %v615_v44 = vmov -1.0   ;;  %vm235_vm3 = vcmask 1043456  }
  0x15   :  { %516 = vmatprep.subr.bf16.mxu0 %v613_v0  ;;  %532 = vmatprep.mubr.msk.bf16.mxu0 %vm614_vm0, %v613_v0  ;;  %v61_v4 = vpack.c.bf16 %v60_v3, %v60_v3  ;;  %v546_v5 = vld [vmem:[%s817_s6] sm:$0xff]   ;;  %v549_v52 = vld [vmem:[%s821_s10 + $0x8] sm:$0xff]   ;;  %v550_v58 = vld [vmem:[%s821_s10 + $0x10] sm:$0xff]  }
  0x16   :  { %501 = vmatpush3.bf16.msra.mxu1 %v544_v1  ;;  %v464_v7 = vld [vmem:[%s814_s3] ss:$0 sm:$0xff]  ;;  %v551_v59 = vld [vmem:[%s821_s10 + $0x18] sm:$0xff]   ;;  %v553_v61 = vld [vmem:[%s821_s10 + $0x28] sm:$0xff]  }
  0x17   :  { %502 = vmatprep.subr.bf16.mxu1 %v613_v0  ;;  %v468_v9 = vld [vmem:[%s815_s4] ss:$0 sm:$0xff]  ;;  %v554_v62 = vld [vmem:[%s821_s10 + $0x30] sm:$0xff]   ;;  %v555_v63 = vld [vmem:[%s821_s10 + $0x38] sm:$0xff]  }
  0x18   :  { %v129_v12 = vld [vmem:[%s812_s1] sm:$0xf] }
  0x19   :  { %v469_v18 = vld [vmem:[%s818_s7] ss:$0 sm:$0xff] }
  0x1a   :  { %503 = vmatpush3.bf16.msra.mxu1 %v545_v2  ;;  %v548_v51 = vld [vmem:[%s821_s10] sm:$0xff]  }
  0x1b   :  { %508 = vmatprep.subr.bf16.mxu1 %v613_v0  ;;  %517 = vmatpush3.bf16.msra.mxu0 %v548_v51  ;;  %v552_v60 = vld [vmem:[%s821_s10 + $0x20] sm:$0xff]  }
  0x1c   :  { %518 = vmatprep.subr.bf16.mxu0 %v613_v0 }
  0x1d   :  { %505 = vmatmul.mubr.msk.bf16.vlgmr.msra.gmra.mrb[0].mxu1 %vm85_vm1, %v61_v4 }
  0x1e   :  { %512 = vmatprep.mubr.msk.bf16.mxu1 %vm614_vm0, %v613_v0  ;;  %509 = vmatpush3.bf16.msra.mxu1 %v546_v5  ;;  %v473_v5 = vld [vmem:[%s819_s8] ss:$0 sm:$0xff] }
  0x1f   :  { %510 = vmatprep.subr.bf16.mxu1 %v613_v0  ;;  %519 = vmatpush3.bf16.msra.mxu0 %v549_v52 }
  0x20   :  { %520 = vmatprep.subr.bf16.mxu0 %v613_v0 }
  0x22   :  { %511 = vmatpush3.bf16.msra.mxu1 %v547_v6 }
  0x23   :  { %521 = vmatpush3.bf16.msra.mxu0 %v550_v58 }
  0x24   :  { %522 = vmatprep.subr.bf16.mxu0 %v613_v0 }
  0x27   :  { %523 = vmatpush3.bf16.msra.mxu0 %v551_v59 }
  0x28   :  { %524 = vmatprep.subr.bf16.mxu0 %v613_v0 }
  0x2b   :  { %525 = vmatpush3.bf16.msra.mxu0 %v552_v60 }
  0x2c   :  { %526 = vmatprep.subr.bf16.mxu0 %v613_v0 }
  0x2f   :  { %527 = vmatpush3.bf16.msra.mxu0 %v553_v61 }
  0x30   :  { %528 = vmatprep.subr.bf16.mxu0 %v613_v0 }
  0x33   :  { %529 = vmatpush3.bf16.msra.mxu0 %v554_v62 }
  0x34   :  { %530 = vmatprep.subr.bf16.mxu0 %v613_v0  ;;  %v389_v0 = vlaneseq }
  0x37   :  { %531 = vmatpush3.bf16.msra.mxu0 %v555_v63 }
  0xf0   :  { %v123_v8 = vpop.f32.mrb[0].mxu1 }
  0xf1   :  { %v124_v10 = vadd.f32 %v464_v7, %v123_v8  ;;  %v506_v11 = vpop.f32.mrb[1].mxu1  ;;  %v474_v7 = vld [vmem:[%s820_s9] ss:$0 sm:$0xff] }
  0xf2   :  { %v126_v13 = vpop.f32.mrb[2].mxu1  ;;  %v616_v11 = vmov 1966171168  }
  0xf3   :  { %v137_v14 = vmul.f32 %v468_v9, %v124_v10  ;;  %v507_v15 = vpop.f32.mrb[3].mxu1  ;;  %v475_v13 = vld [vmem:[%s822_s11] ss:$0 sm:$0xff] }
  0xf5   :  { %v736_v16 = vadd.f32 %v137_v14, %v129_v12  ;;  %v394_v12 = vunpack.c.l.s4 %v616_v11  ;;  %v390_v14 = vshrl.u32 %v389_v0, 7 }
  0xf7   :  { %v139_v17 = vpack.c.bf16 %v736_v16, %v736_v16  ;;  %v395_v15 = vunpack.c.0.s8 %v394_v12  ;;  %vm391_vm4 = vcmp.eq.s32.totalorder %v390_v14, 0 }
  0xf9   :  { %513 = vmatmul.mubr.msk.bf16.vlgmr.msra.gmra.mrb[4].mxu1 %vm85_vm1, %v139_v17 }
 0x1cc   :  { %v200_v19 = vpop.f32.mrb[4].mxu1 }
 0x1cd   :  { %v201_v20 = vadd.f32 %v469_v18, %v200_v19  ;;  %v514_v21 = vpop.f32.mrb[5].mxu1  ;;  %v484_v18 = vld [vmem:[%s816_s5] ss:$0 sm:$0xff]  ;;  %s617_s5 = smov [#allocation5]  }
 0x1ce   :  { %v203_v22 = vpop.f32.mrb[6].mxu1  ;;  %s452_s9 = sshll.u32 %s617_s5, 4  ;;  %s453_s9 = int_to_ptr.vmem [resolvable:$true] %s452_s9 }
 0x1cf   :  { %v207_v23 = vmul.f32 0.70710677, %v201_v20  ;;  %v515_v24 = vpop.f32.mrb[7].mxu1  ;;  %v206_v47 = vmul.f32 0.5, %v201_v20  ;;  %s584_s11 = scalar_lea.vmem %s453_s9, 512  ;;  %p589_p9 = scmp.lt.s32.totalorder %s453_s9, %s453_s9 }
 0x1d0   :  { %p585_p8 = scmp.ne.s32.totalorder %s453_s9, %s584_s11  ;;  %p590_p10 = scmp.lt.s32.totalorder %s584_s11, %s584_s11 }
 0x1d1   :  { %v210_v25 = vand.u32 2147483647, %v207_v23  ;;  %vm208_vm2 = vcmp.ge.f32.partialorder %v207_v23, 0.0  ;;  %v398_v23 = vsub.s32 %v395_v15, %v390_v14 }
 0x1d2   :  { %v209_v45 = vsel %vm208_vm2, 1.0, %v615_v44  ;;  %p591_p11 = por %p590_p10, %p589_p9 }
 0x1d3   :  { %v211_v26 = vmul.f32 0.3275911, %v210_v25  ;;  %v224_v28 = vsub.f32 0.0, %v210_v25 }
 0x1d4   :  { %p592_p12 = pnand %p591_p11, %p585_p8 }
 0x1d5   :  { %v212_v27 = vadd.f32 1.0, %v211_v26  ;;  %v225_v30 = vmul.f32 %v224_v28, %v210_v25 }
 0x1d7   :  { %556 = vrcp.f32 %v212_v27  ;;  %v226_v33 = vmul.f32 1.442695, %v225_v30  ;;  %v421_v27 = vsub.s32 0, %v390_v14  ;;  %v385_v30 = vld [vmem:[#allocation2] sm:$0xff] }
 0x1d9   :  { %558 = vpow2.f32 %v226_v33 }
 0x1e1   :  { %v557_v29 = vpop.eup %556 }
 0x1e2   :  { %v215_v31 = vmul.f32 1.0614054, %v557_v29 }
 0x1e3   :  { %v559_v41 = vpop.eup %558 }
 0x1e4   :  { %v216_v32 = vadd.f32 -1.4531521, %v215_v31 }
 0x1e6   :  { %v217_v34 = vmul.f32 %v557_v29, %v216_v32 }
 0x1e8   :  { %v218_v35 = vadd.f32 1.4214138, %v217_v34  ;;  %v386_v34 = vld [vmem:[#allocation2 + $0x8] sm:$0xff] }
 0x1ea   :  { %v219_v36 = vmul.f32 %v557_v29, %v218_v35  ;;  %v387_v35 = vld [vmem:[#allocation2 + $0x10] sm:$0xff] }
 0x1ec   :  { %v220_v37 = vadd.f32 -0.28449672, %v219_v36 }
 0x1ee   :  { %v221_v38 = vmul.f32 %v557_v29, %v220_v37 }
 0x1f0   :  { %v222_v39 = vadd.f32 0.2548296, %v221_v38 }
 0x1f2   :  { %v223_v40 = vmul.f32 %v557_v29, %v222_v39 }
 0x1f4   :  { %v228_v42 = vmul.f32 %v559_v41, %v223_v40  ;;  %v388_v40 = vld [vmem:[#allocation2 + $0x18] sm:$0xff] }
 0x1f6   :  { %v229_v43 = vsub.f32 1.0, %v228_v42 }
 0x1f8   :  { %v230_v46 = vmul.f32 %v229_v43, %v209_v45 }
 0x1fa   :  { %v231_v48 = vadd.f32 1.0, %v230_v46 }
 0x1fc   :  { %v232_v49 = vmul.f32 %v231_v48, %v206_v47 }
 0x1fe   :  { %v236_v50 = vsel %vm235_vm3, %v232_v49, 0.0 }
 0x1ff   :  { %237 = vadd.xlane.f32.xlu0 %v236_v50 }
 0x28c   :  { %v238_v53 = vpop.xlane.xlu0 %237 }
 0x28d   :  { %v240_v54 = vmul.f32 0.0078125, %v238_v53 }
 0x28f   :  { %v241_v55 = vsub.f32 %v232_v49, %v240_v54 }
 0x291   :  { %v242_v56 = vmul.f32 %v241_v55, %v241_v55 }
 0x293   :  { %v243_v57 = vsel %vm235_vm3, %v242_v56, 0.0 }
 0x294   :  { %244 = vadd.xlane.f32.xlu0 %v243_v57 }
 0x321   :  { %v245_v1 = vpop.xlane.xlu0 %244 }
 0x322   :  { %v246_v2 = vmul.f32 0.0078125, %v245_v1 }
 0x324   :  { %v247_v3 = vadd.f32 1e-05, %v246_v2 }
 0x326   :  { %560 = vrsqrt.f32 %v247_v3 }
 0x330   :  { %v561_v4 = vpop.eup %560 }
 0x331   :  { %v249_v6 = vmul.f32 %v561_v4, %v241_v55 }
 0x333   :  { %v256_v8 = vmul.f32 %v473_v5, %v249_v6 }
 0x335   :  { %v263_v9 = vadd.f32 %v474_v7, %v256_v8 }
 0x337   :  { %v264_v10 = vpack.c.bf16 %v263_v9, %v263_v9 }
 0x339   :  { %533 = vmatmul.mubr.bf16.vlgmr.msra.gmra.mrb[0].mxu0 %v264_v10 }
 0x40c   :  { %v370_v17 = vpop.f32.mrb[0].mxu0 }
 0x40d   :  { %v371_v19 = vadd.f32 %v475_v13, %v370_v17  ;;  %v534_v20 = vpop.f32.mrb[1].mxu0 }
 0x40e   :  { %v373_v21 = vpop.f32.mrb[2].mxu0 }
 0x40f   :  { %v383_v22 = vmul.f32 %v484_v18, %v371_v19  ;;  %v535_v24 = vpop.f32.mrb[3].mxu0 }
 0x411   :  { %v384_v25 = vadd.f32 %v383_v22, %v736_v16 }
 0x413   :  { %v399_v26 = vrot.slane %v384_v25, %v398_v23 }
 0x415   :  { %v400_v28 = vcombine.high %v399_v26, %v399_v26  ;;  %v407_v29 = vrot.slane %v399_v26, %v398_v23 }
 0x417   :  { %v414_v31 = vrot.slane %v400_v28, %v398_v23  ;;  %v415_v32 = vcombine.high %v407_v29, %v407_v29  ;;  %v422_v33 = vrot.slane %v407_v29, %v421_v27 }
 0x419   :  { %v416_v36 = vcombine.high %v414_v31, %v414_v31  ;;  %v426_v37 = vrot.slane %v414_v31, %v421_v27  ;;  %v430_v38 = vrot.slane %v415_v32, %v421_v27  ;;  %v439_v39 = vsel %vm391_vm4, %v422_v33, %v385_v30 }
 0x41a   :  { %443 = vst.msk [vmem:[#allocation5] sm:$0xff] %vm85_vm1, %v439_v39 }
 0x41b   :  { %v434_v16 = vrot.slane %v416_v36, %v421_v27  ;;  %v440_v41 = vsel %vm391_vm4, %v426_v37, %v386_v34  ;;  %v441_v42 = vsel %vm391_vm4, %v430_v38, %v387_v35 }
 0x41c   :  { %444 = vst.msk [vmem:[#allocation5 + $0x8] sm:$0xff] %vm85_vm1, %v440_v41  ;;  %445 = vst.msk [vmem:[#allocation5 + $0x10] sm:$0xff] %vm85_vm1, %v441_v42 }
 0x41d   :  { %v442_v43 = vsel %vm391_vm4, %v434_v16, %v388_v40 }
 0x41e   :  { %446 = vst.msk [vmem:[#allocation5 + $0x18] sm:$0xff] %vm85_vm1, %v442_v43 }
 0x41f   :  { %595 = shalt.err (!%p592_p12)
}
 0x420   :  { %s596_s4 = scalar_lea.hbm %s824_s13, 512 }
 0x421   :  { %p597_p13 = scmp.ne.s32.totalorder %s824_s13, %s596_s4  ;;  %p600_p0 = scmp.lt.u32.totalorder %s596_s4, %s824_s13 }
 0x423   :  { %p602_p1 = pnand %p600_p0, %p597_p13 }
 0x425   :  { %605 = shalt.err (!%p602_p1)
}
 0x426   :  { %458 = dma.vmem_to_hbm [thread:$0]  %s453_s9, 512, %s824_s13, [#allocation4], %s611_s18, %s611_s18, %s612_s19  }
 0x427   :  { %608 = dma.done.wait [#allocation4], 512  }
 0x428   :  { %609 = vsyncadd [#allocation4], 4294966784 }
 0x429   :  { %462 = vsyncpa [#allocation3], 1 }
 0x42a   :  { %463 = vsyncpa [#allocation4], 1 }

// kernel: _lambda_.2
= control target key start
LH: loop header
LB: loop body
LE: loop exit
PB: predicated region body
PF: predicated region fallthrough
CT: control target
= control target key end

     0   :  { %16 = vsyncpa [#allocation3], 0  ;;  %s1580_s0 = inlined_call_operand.vmem [shape: f32[32,32], index: 0, kind: input, shape index: {}]   ;;  %s1581_s1 = inlined_call_operand.vmem [shape: f32[4,32], index: 1, kind: input, shape index: {}]   ;;  %s1582_s2 = inlined_call_operand.vmem [shape: f32[1,32], index: 2, kind: input, shape index: {}]   ;;  %s1583_s3 = inlined_call_operand.vmem [shape: f32[1,32], index: 3, kind: input, shape index: {}]   ;;  %s1584_s4 = inlined_call_operand.hbm [shape: bf16[32,32], index: 4, kind: input, shape index: {}]   ;;  %s1585_s5 = inlined_call_operand.hbm [shape: bf16[32,64], index: 5, kind: input, shape index: {}]   ;;  %s1586_s6 = inlined_call_operand.vmem [shape: f32[32,4], index: 6, kind: input, shape index: {}]   ;;  %s1587_s7 = inlined_call_operand.vmem [shape: f32[4,32], index: 7, kind: input, shape index: {}]   ;;  %s1588_s8 = inlined_call_operand.vmem [shape: f32[1,32], index: 8, kind: input, shape index: {}]   ;;  %s1589_s9 = inlined_call_operand.vmem [shape: f32[4,32], index: 9, kind: output, shape index: {0}]   ;;  %s1590_s10 = inlined_call_operand.hbm [shape: f32[32,32], index: 10, kind: output, shape index: {1}]  }
   0x1   :  { %17 = vsyncpa [#allocation6], 0 }
   0x2   :  { %18 = vsyncpa [#allocation4], 0  ;;  %s1317_s13 = smov [#allocation2]   ;;  %s1245_s17 = scalar_lea.hbm %s1584_s4, 256 }
   0x3   :  { %s32_s14 = sshll.u32 %s1317_s13, 4  ;;  %p1246_p0 = scmp.ne.s32.totalorder %s1584_s4, %s1245_s17  ;;  %s33_s14 = int_to_ptr.vmem [resolvable:$true] %s32_s14 }
   0x4   :  { %p1249_p1 = scmp.lt.u32.totalorder %s1245_s17, %s1584_s4 }
   0x6   :  { %p1251_p2 = pnand %p1249_p1, %p1246_p0 }
   0x8   :  { %1254 = shalt.err (!%p1251_p2)
}
   0x9   :  { %s1255_s22 = scalar_lea.vmem %s33_s14, 256  ;;  %p1260_p4 = scmp.lt.s32.totalorder %s33_s14, %s33_s14 }
   0xa   :  { %p1256_p3 = scmp.ne.s32.totalorder %s33_s14, %s1255_s22  ;;  %p1261_p5 = scmp.lt.s32.totalorder %s1255_s22, %s1255_s22 }
   0xc   :  { %p1262_p6 = por %p1261_p5, %p1260_p4 }
   0xe   :  { %p1263_p7 = pnand %p1262_p6, %p1256_p3 }
  0x10   :  { %1266 = shalt.err (!%p1263_p7)
}
  0x11   :  { %s1318_s23 = smov 64   ;;  %s1319_s24 = smov 4  }
  0x12   :  { %38 = dma.hbm_to_vmem [thread:$0]  %s1584_s4, 256, %s33_s14, [#allocation3], %s1318_s23, %s1318_s23, %s1319_s24  }
  0x13   :  { %s1320_s27 = smov [#allocation5]   ;;  %s1267_s11 = scalar_lea.hbm %s1585_s5, 256 }
  0x14   :  { %s44_s28 = sshll.u32 %s1320_s27, 4  ;;  %p1268_p8 = scmp.ne.s32.totalorder %s1585_s5, %s1267_s11  ;;  %s45_s28 = int_to_ptr.vmem [resolvable:$true] %s44_s28 }
  0x15   :  { %p1271_p9 = scmp.lt.u32.totalorder %s1267_s11, %s1585_s5 }
  0x17   :  { %p1273_p10 = pnand %p1271_p9, %p1268_p8 }
  0x19   :  { %1276 = shalt.err (!%p1273_p10)
}
  0x1a   :  { %s1277_s17 = scalar_lea.vmem %s45_s28, 256  ;;  %p1282_p12 = scmp.lt.s32.totalorder %s45_s28, %s45_s28 }
  0x1b   :  { %p1278_p11 = scmp.ne.s32.totalorder %s45_s28, %s1277_s17  ;;  %p1283_p13 = scmp.lt.s32.totalorder %s1277_s17, %s1277_s17 }
  0x1d   :  { %p1284_p0 = por %p1283_p13, %p1282_p12 }
  0x1f   :  { %p1285_p1 = pnand %p1284_p0, %p1278_p11 }
  0x21   :  { %1288 = shalt.err (!%p1285_p1)
}
  0x22   :  { %50 = dma.hbm_to_vmem [thread:$0]  %s1585_s5, 256, %s45_s28, [#allocation6], %s1318_s23, %s1318_s23, %s1319_s24  }
  0x23   :  { %1311 = dma.done.wait [#allocation3], 256  }
  0x24   :  { %1312 = vsyncadd [#allocation3], 4294967040 }
  0x25   :  { %1313 = dma.done.wait [#allocation6], 256  }
  0x26   :  { %1314 = vsyncadd [#allocation6], 4294967040  ;;  %vm70_vm0 = vcmask 261120   ;;  %vm241_vm1 = vcmask 257024   ;;  %v1410_v0 = vld [vmem:[%s1580_s0] sm:$0xff]  ;;  %v1418_v2 = vld [vmem:[%s1580_s0 + $0x8] sm:$0xff] }
  0x27   :  { %v240_v1 = vld [vmem:[%s1581_s1] sm:$0xf]  ;;  %v71_v3 = vsel %vm70_vm0, %v1410_v0, 0.0  ;;  %v74_v5 = vsel %vm70_vm0, %v1418_v2, 0.0  ;;  %v1428_v6 = vld [vmem:[%s1580_s0 + $0x10] sm:$0xff]  ;;  %v1435_v8 = vld [vmem:[%s1580_s0 + $0x18] sm:$0xff] }
  0x28   :  { %v242_v4 = vsel %vm241_vm1, %v240_v1, 0.0  ;;  %72 = vadd.xlane.f32.xlu0 %v71_v3  ;;  %v77_v7 = vsel %vm70_vm0, %v1428_v6, 0.0  ;;  %v80_v9 = vsel %vm70_vm0, %v1435_v8, 0.0  ;;  %v1215_v35 = vld [vmem:[#allocation2] sm:$0xff]   ;;  %v1321_v36 = vmov 0.0   ;;  %v1216_v37 = vld [vmem:[#allocation5] sm:$0xff]  }
  0x29   :  { %243 = vadd.xlane.f32.xlu1 %v242_v4  ;;  %1103 = vmatprep.subr.bf16.mxu1 %v1321_v36  ;;  %v1217_v38 = vld [vmem:[#allocation2 + $0x8] sm:$0xff]   ;;  %v1218_v39 = vld [vmem:[#allocation5 + $0x8] sm:$0xff]   ;;  %vm1322_vm2 = vmmov 0   ;;  %v1323_v40 = vmov 0.0|0.0   ;;  %v1042_v57 = vld [vmem:[%s1582_s2] ss:$0 sm:$0xff] }
  0x2a   :  { %1104 = vmatpush3.bf16.msra.mxu1 %v1215_v35  ;;  %1095 = vmatprep.subr.bf16.mxu0 %v1216_v37  ;;  %v1043_v59 = vld [vmem:[%s1583_s3] ss:$0 sm:$0xff]  ;;  %vm445_vm3 = vcmask 1043456   ;;  %vm400_vm4 = vcmask 31744   ;;  %vm441_vm5 = vcmask 64512   ;;  %s1325_s17 = smov [#allocation7]  }
  0x2b   :  { %1105 = vmatprep.subr.bf16.mxu1 %v1321_v36  ;;  %1096 = vmatpush3.bf16.msra.mxu0 %v1216_v37  ;;  %v1044_v62 = vld [vmem:[%s1588_s8] ss:$0 sm:$0xff]  ;;  %v322_v37 = vlaneseq  ;;  %s1027_s4 = sshll.u32 %s1325_s17, 4  ;;  %s1028_s4 = int_to_ptr.vmem [resolvable:$true] %s1027_s4 }
  0x2c   :  { %75 = vadd.xlane.f32.xlu0 %v74_v5  ;;  %1107 = vmatprep.mubr.msk.bf16.mxu1 %vm1322_vm2, %v1321_v36  ;;  %s1289_s14 = scalar_lea.vmem %s1028_s4, 512  ;;  %p1294_p3 = scmp.lt.s32.totalorder %s1028_s4, %s1028_s4 }
  0x2d   :  { %78 = vadd.xlane.f32.xlu1 %v77_v7  ;;  %1097 = vmatprep.subr.bf16.mxu0 %v1218_v39  ;;  %p1290_p2 = scmp.ne.s32.totalorder %s1028_s4, %s1289_s14  ;;  %p1295_p4 = scmp.lt.s32.totalorder %s1289_s14, %s1289_s14 }
  0x2e   :  { %1106 = vmatpush3.bf16.msra.mxu1 %v1217_v38  ;;  %v323_v38 = vshrl.u32 %v322_v37, 7 }
  0x2f   :  { %1122 = vmatprep.subr.bf16.mxu1 %v1321_v36  ;;  %1098 = vmatpush3.bf16.msra.mxu0 %v1218_v39  ;;  %p1296_p5 = por %p1295_p4, %p1294_p3 }
  0x30   :  { %81 = vadd.xlane.f32.xlu0 %v80_v9  ;;  %1179 = vmatprep.subr.bf16.mxu0 %v1323_v40 }
  0x31   :  { %p1297_p6 = pnand %p1296_p5, %p1290_p2 }
  0xb5   :  { %v73_v10 = vpop.xlane.xlu0 %72 }
  0xb6   :  { %v244_v11 = vpop.xlane.xlu1 %243  ;;  %v84_v12 = vmul.f32 0.03125, %v73_v10 }
  0xb7   :  { %v245_v13 = vmul.f32 0.03125, %v244_v11 }
  0xb8   :  { %v1440_v14 = vsub.f32 %v1410_v0, %v84_v12 }
  0xb9   :  { %v1442_v15 = vsub.f32 %v240_v1, %v245_v13  ;;  %v76_v16 = vpop.xlane.xlu0 %75 }
  0xba   :  { %v79_v17 = vpop.xlane.xlu1 %78  ;;  %v85_v18 = vmul.f32 0.03125, %v76_v16  ;;  %v92_v20 = vmul.f32 %v1440_v14, %v1440_v14 }
  0xbb   :  { %v86_v19 = vmul.f32 0.03125, %v79_v17  ;;  %v247_v21 = vmul.f32 %v1442_v15, %v1442_v15 }
  0xbc   :  { %v1449_v22 = vsub.f32 %v1418_v2, %v85_v18  ;;  %v96_v24 = vsel %vm70_vm0, %v92_v20, 0.0 }
  0xbd   :  { %v1452_v23 = vsub.f32 %v1428_v6, %v86_v19  ;;  %97 = vadd.xlane.f32.xlu1 %v96_v24  ;;  %v82_v25 = vpop.xlane.xlu0 %81  ;;  %v248_v27 = vsel %vm241_vm1, %v247_v21, 0.0 }
  0xbe   :  { %v87_v26 = vmul.f32 0.03125, %v82_v25  ;;  %v93_v28 = vmul.f32 %v1449_v22, %v1449_v22 }
  0xbf   :  { %v94_v29 = vmul.f32 %v1452_v23, %v1452_v23 }
  0xc0   :  { %v1461_v30 = vsub.f32 %v1435_v8, %v87_v26  ;;  %v99_v31 = vsel %vm70_vm0, %v93_v28, 0.0 }
  0xc1   :  { %249 = vadd.xlane.f32.xlu1 %v248_v27  ;;  %100 = vadd.xlane.f32.xlu0 %v99_v31  ;;  %v102_v32 = vsel %vm70_vm0, %v94_v29, 0.0 }
  0xc2   :  { %v95_v33 = vmul.f32 %v1461_v30, %v1461_v30 }
  0xc4   :  { %v105_v34 = vsel %vm70_vm0, %v95_v33, 0.0  ;;  %v319_v33 = vld [vmem:[%s1586_s6 + $0x10] sm:$0xff] }
  0xc5   :  { %103 = vadd.xlane.f32.xlu0 %v102_v32  ;;  %106 = vadd.xlane.f32.xlu1 %v105_v34  ;;  %v317_v32 = vld [vmem:[%s1586_s6] sm:$0xff]  ;;  %v320_v34 = vld [vmem:[%s1586_s6 + $0x18] sm:$0xff] }
  0xc6   :  { %v1183_v35 = vpack.c.bf16 %v320_v34, %v319_v33 }
 0x14a   :  { %v98_v41 = vpop.xlane.xlu1 %97 }
 0x14b   :  { %v108_v42 = vmul.f32 0.03125, %v98_v41  ;;  %v671_v41 = vsub.s32 2, %v323_v38 }
 0x14d   :  { %v112_v43 = vadd.f32 1e-05, %v108_v42 }
 0x14e   :  { %v250_v44 = vpop.xlane.xlu1 %249  ;;  %v101_v45 = vpop.xlane.xlu0 %100 }
 0x14f   :  { %1219 = vrsqrt.f32 %v112_v43  ;;  %v251_v46 = vmul.f32 0.03125, %v250_v44  ;;  %v109_v47 = vmul.f32 0.03125, %v101_v45  ;;  %v324_v43 = vsub.s32 0, %v323_v38 }
 0x150   :  { %v843_v45 = vsub.s32 3, %v323_v38 }
 0x151   :  { %v252_v48 = vadd.f32 1e-05, %v251_v46  ;;  %v113_v49 = vadd.f32 1e-05, %v109_v47  ;;  %v499_v47 = vsub.s32 1, %v323_v38 }
 0x152   :  { %v107_v50 = vpop.xlane.xlu1 %106  ;;  %v104_v51 = vpop.xlane.xlu0 %103 }
 0x153   :  { %1221 = vrsqrt.f32 %v252_v48  ;;  %v111_v52 = vmul.f32 0.03125, %v107_v50  ;;  %v110_v53 = vmul.f32 0.03125, %v104_v51 }
 0x154   :  { %1223 = vrsqrt.f32 %v113_v49 }
 0x155   :  { %v115_v54 = vadd.f32 1e-05, %v111_v52  ;;  %v114_v55 = vadd.f32 1e-05, %v110_v53 }
 0x157   :  { %1225 = vrsqrt.f32 %v115_v54 }
 0x158   :  { %1227 = vrsqrt.f32 %v114_v55 }
 0x159   :  { %v1220_v56 = vpop.eup %1219 }
 0x15a   :  { %v120_v58 = vmul.f32 %v1220_v56, %v1440_v14 }
 0x15c   :  { %v130_v60 = vmul.f32 %v1042_v57, %v120_v58 }
 0x15d   :  { %v1222_v61 = vpop.eup %1221 }
 0x15e   :  { %v1224_v63 = vpop.eup %1223  ;;  %v140_v1 = vadd.f32 %v1043_v59, %v130_v60  ;;  %v254_v3 = vmul.f32 %v1222_v61, %v1442_v15 }
 0x15f   :  { %v121_v4 = vmul.f32 %v1224_v63, %v1449_v22 }
 0x160   :  { %v151_v5 = vmul.f32 %v1044_v62, %v140_v1  ;;  %v255_v7 = vmul.f32 %v1042_v57, %v254_v3 }
 0x161   :  { %v1226_v9 = vpop.eup %1225  ;;  %v131_v10 = vmul.f32 %v1042_v57, %v121_v4 }
 0x162   :  { %v1228_v11 = vpop.eup %1227  ;;  %v123_v12 = vmul.f32 %v1226_v9, %v1461_v30  ;;  %v155_v13 = vadd.f32 %v151_v5, %v1410_v0  ;;  %v256_v14 = vadd.f32 %v1043_v59, %v255_v7 }
 0x163   :  { %v122_v16 = vmul.f32 %v1228_v11, %v1452_v23  ;;  %v141_v17 = vadd.f32 %v1043_v59, %v131_v10 }
 0x164   :  { %v159_v18 = vmul.f32 2.0, %v155_v13  ;;  %v257_v19 = vpack.c.bf16 %v256_v14, %v256_v14  ;;  %v133_v20 = vmul.f32 %v1042_v57, %v123_v12 }
 0x165   :  { %v152_v21 = vmul.f32 %v1044_v62, %v141_v17  ;;  %v167_v15 = vpack.c.bf16 %v141_v17, %v140_v1  ;;  %v132_v24 = vmul.f32 %v1042_v57, %v122_v16 }
 0x166   :  { %163 = vst.msk [vmem:[#allocation7] sm:$0xff] %vm70_vm0, %v159_v18  ;;  %1108 = vmatmul.mubr.msk.bf16.vlgmr.msra.gmra.mrb[0].mxu1 %vm70_vm0, %v257_v19  ;;  %v143_v22 = vadd.f32 %v1043_v59, %v133_v20 }
 0x167   :  { %v156_v25 = vadd.f32 %v152_v21, %v1418_v2  ;;  %1099 = vmatprep.mubr.msk.bf16.mxu0 %vm70_vm0, %v167_v15  ;;  %v142_v0 = vadd.f32 %v1043_v59, %v132_v24  ;;  %1124 = vmatprep.mubr.msk.bf16.mxu1 %vm1322_vm2, %v1321_v36 }
 0x168   :  { %v154_v23 = vmul.f32 %v1044_v62, %v143_v22 }
 0x169   :  { %v160_v26 = vmul.f32 2.0, %v156_v25  ;;  %v153_v27 = vmul.f32 %v1044_v62, %v142_v0  ;;  %v168_v28 = vpack.c.bf16 %v143_v22, %v142_v0 }
 0x16a   :  { %v158_v29 = vadd.f32 %v154_v23, %v1435_v8  ;;  %v318_v8 = vld [vmem:[%s1586_s6 + $0x8] sm:$0xff]  ;;  %s1324_s6 = smov 96  }
 0x16b   :  { %164 = vst.msk [vmem:[#allocation7 + $0x8] sm:$0xff] %vm70_vm0, %v160_v26  ;;  %v157_v30 = vadd.f32 %v153_v27, %v1428_v6  ;;  %1100 = vmatmul.mubr.msk.bf16.vlgmr.msra.gmra.mrb[0].mxu0 %vm70_vm0, %v168_v28  ;;  %v1180_v6 = vpack.c.bf16 %v318_v8, %v317_v32 }
 0x16c   :  { %v162_v31 = vmul.f32 2.0, %v158_v29  ;;  %1119 = vmatprep.mubr.msk.f32.mxu0 %vm1322_vm2, %v1321_v36 }
 0x16d   :  { %v161_v2 = vmul.f32 2.0, %v157_v30  ;;  %1181 = vmatpush3.bf16.msra.mxu0 %v1180_v6 }
 0x16e   :  { %166 = vst.msk [vmem:[#allocation7 + $0x18] sm:$0xff] %vm70_vm0, %v162_v31  ;;  %1182 = vmatprep.subr.bf16.mxu0 %v1323_v40 }
 0x16f   :  { %165 = vst.msk [vmem:[#allocation7 + $0x10] sm:$0xff] %vm70_vm0, %v161_v2 }
 0x171   :  { %1184 = vmatpush3.bf16.msra.mxu0 %v1183_v35 }
 0x172   :  { %1185 = vmatprep.subr.bf16.mxu0 %v1323_v40 }
 0x239   :  { %v311_v39 = vpop.f32.mrb[0].mxu1 }
 0x23a   :  { %v1109_v42 = vpop.f32.mrb[1].mxu1  ;;  %v672_v48 = vrot.slane %v311_v39, %v671_v41  ;;  %v325_v50 = vrot.slane %v311_v39, %v324_v43  ;;  %v844_v54 = vrot.slane %v311_v39, %v843_v45  ;;  %v500_v58 = vrot.slane %v311_v39, %v499_v47 }
 0x23b   :  { %v314_v44 = vpop.f32.mrb[2].mxu1 }
 0x23c   :  { %v1110_v46 = vpop.f32.mrb[3].mxu1 }
 0x23e   :  { %v1101_v49 = vpop.f32.mrb[0].mxu0 }
 0x23f   :  { %v673_v51 = vmul.f32 %v1101_v49, %v672_v48  ;;  %v767_v52 = vpack.c.bf16 %v1101_v49, %v1101_v49  ;;  %v225_v53 = vpop.f32.mrb[1].mxu0 }
 0x240   :  { %v326_v55 = vmul.f32 %v325_v50, %v225_v53  ;;  %v421_v56 = vpack.c.bf16 %v225_v53, %v225_v53  ;;  %v1102_v57 = vpop.f32.mrb[2].mxu0 }
 0x241   :  { %v845_v59 = vmul.f32 %v1102_v57, %v844_v54  ;;  %785 = vrot.lane.b32.xlu1 %v767_v52, %s1324_s6  ;;  %v228_v60 = vpop.f32.mrb[3].mxu0  ;;  %v939_v63 = vpack.c.bf16 %v1102_v57, %v1102_v57 }
 0x242   :  { %v501_v61 = vmul.f32 %v500_v58, %v228_v60  ;;  %v595_v62 = vpack.c.bf16 %v228_v60, %v228_v60  ;;  %439 = vrot.lane.b32.xlu0 %v421_v56, %s1324_s6  ;;  %1120 = vmatmul.mubr.msk.f32.vlgmr.msra.gmra.mrb[4].mxu0 %vm70_vm0, %v326_v55 }
 0x243   :  { %1187 = vmatpush3.bf16.msra.mxu0 %v1180_v6  ;;  %1136 = vmatprep.mubr.msk.f32.mxu0 %vm1322_vm2, %v1321_v36 }
 0x244   :  { %1188 = vmatprep.subr.bf16.mxu0 %v1323_v40 }
 0x245   :  { %613 = vrot.lane.b32.xlu1 %v595_v62, %s1324_s6 }
 0x246   :  { %957 = vrot.lane.b32.xlu0 %v939_v63, %s1324_s6 }
 0x247   :  { %1190 = vmatpush3.bf16.msra.mxu0 %v1183_v35 }
 0x248   :  { %1191 = vmatprep.subr.bf16.mxu0 %v1323_v40 }
 0x24a   :  { %1137 = vmatmul.mubr.msk.f32.vlgmr.msra.gmra.mrb[6].mxu0 %vm70_vm0, %v501_v61 }
 0x24b   :  { %1193 = vmatpush3.bf16.msra.mxu0 %v1180_v6  ;;  %1153 = vmatprep.mubr.msk.f32.mxu0 %vm1322_vm2, %v1321_v36 }
 0x24c   :  { %1194 = vmatprep.subr.bf16.mxu0 %v1323_v40 }
 0x24f   :  { %1196 = vmatpush3.bf16.msra.mxu0 %v1183_v35 }
 0x250   :  { %1197 = vmatprep.subr.bf16.mxu0 %v1323_v40 }
 0x252   :  { %1154 = vmatmul.mubr.msk.f32.vlgmr.msra.gmra.mrb[8].mxu0 %vm70_vm0, %v673_v51 }
 0x253   :  { %1199 = vmatpush3.bf16.msra.mxu0 %v1180_v6  ;;  %1170 = vmatprep.mubr.msk.f32.mxu0 %vm1322_vm2, %v1321_v36 }
 0x254   :  { %1200 = vmatprep.subr.bf16.mxu0 %v1323_v40 }
 0x257   :  { %1202 = vmatpush3.bf16.msra.mxu0 %v1183_v35 }
 0x25a   :  { %1171 = vmatmul.mubr.msk.f32.vlgmr.msra.gmra.mrb[10].mxu0 %vm70_vm0, %v845_v59 }
 0x2b4   :  { %v440_v1 = vpop.permute.xlu0 %439 }
 0x2b5   :  { %v447_v3 = vsel %vm445_vm3, %v440_v1, 0 }
 0x2b6   :  { %1123 = vmatpush3.bf16.msra.mxu1 %v447_v3 }
 0x2b7   :  { %1139 = vmatprep.subr.bf16.mxu1 %v1321_v36 }
 0x315   :  { %v396_v4 = vpop.f32.mrb[4].mxu0 }
 0x316   :  { %v401_v5 = vsel %vm400_vm4, %v396_v4, -inf  ;;  %v1121_v7 = vpop.f32.mrb[5].mxu0 }
 0x317   :  { %v402_v9 = vrot.slane %v401_v5, 4 }
 0x319   :  { %v403_v10 = vmax.f32 %v401_v5, %v402_v9 }
 0x31b   :  { %v404_v11 = vrot.slane %v403_v10, 2 }
 0x31d   :  { %v405_v12 = vmax.f32 %v403_v10, %v404_v11  ;;  %v571_v40 = vpop.f32.mrb[6].mxu0 }
 0x31e   :  { %v575_v13 = vsel %vm400_vm4, %v571_v40, -inf  ;;  %v1138_v14 = vpop.f32.mrb[7].mxu0 }
 0x31f   :  { %v406_v16 = vrot.slane %v405_v12, 1  ;;  %v576_v17 = vrot.slane %v575_v13, 4 }
 0x321   :  { %v407_v18 = vmax.f32 %v405_v12, %v406_v16  ;;  %v577_v19 = vmax.f32 %v575_v13, %v576_v17 }
 0x323   :  { %v408_v20 = vsub.f32 %v396_v4, %v407_v18  ;;  %v578_v21 = vrot.slane %v577_v19, 2 }
 0x325   :  { %v409_v15 = vmul.f32 1.442695, %v408_v20  ;;  %v579_v24 = vmax.f32 %v577_v19, %v578_v21  ;;  %v743_v22 = vpop.f32.mrb[8].mxu0 }
 0x326   :  { %v747_v25 = vsel %vm400_vm4, %v743_v22, -inf  ;;  %v1155_v0 = vpop.f32.mrb[9].mxu0 }
 0x327   :  { %1229 = vpow2.f32 %v409_v15  ;;  %v580_v23 = vrot.slane %v579_v24, 1  ;;  %v748_v26 = vrot.slane %v747_v25, 4 }
 0x329   :  { %v581_v27 = vmax.f32 %v579_v24, %v580_v23  ;;  %v749_v28 = vmax.f32 %v747_v25, %v748_v26 }
 0x32b   :  { %v582_v29 = vsub.f32 %v571_v40, %v581_v27  ;;  %v750_v30 = vrot.slane %v749_v28, 2 }
 0x32d   :  { %v583_v31 = vmul.f32 1.442695, %v582_v29  ;;  %v751_v2 = vmax.f32 %v749_v28, %v750_v30  ;;  %v915_v32 = vpop.f32.mrb[10].mxu0  ;;  %v786_v29 = vpop.permute.xlu1 %785 }
 0x32e   :  { %v919_v8 = vsel %vm400_vm4, %v915_v32, -inf  ;;  %v1172_v6 = vpop.f32.mrb[11].mxu0 }
 0x32f   :  { %1231 = vpow2.f32 %v583_v31  ;;  %v752_v33 = vrot.slane %v751_v2, 1  ;;  %v920_v34 = vrot.slane %v919_v8, 4  ;;  %v791_v6 = vsel %vm445_vm3, %v786_v29, 0 }
 0x331   :  { %v1230_v35 = vpop.eup %1229  ;;  %v753_v37 = vmax.f32 %v751_v2, %v752_v33  ;;  %v921_v38 = vmax.f32 %v919_v8, %v920_v34  ;;  %v614_v30 = vpop.permute.xlu1 %613 }
 0x332   :  { %v411_v39 = vsel %vm400_vm4, %v1230_v35, 0.0  ;;  %v619_v2 = vsel %vm445_vm3, %v614_v30, 0 }
 0x333   :  { %v412_v41 = vrot.slane %v411_v39, 4  ;;  %v754_v42 = vsub.f32 %v743_v22, %v753_v37  ;;  %v922_v43 = vrot.slane %v921_v38, 2 }
 0x335   :  { %v413_v44 = vadd.f32 %v412_v41, %v411_v39  ;;  %v755_v45 = vmul.f32 1.442695, %v754_v42  ;;  %v923_v46 = vmax.f32 %v921_v38, %v922_v43 }
 0x337   :  { %v414_v47 = vrot.slane %v413_v44, 2  ;;  %1233 = vpow2.f32 %v755_v45  ;;  %v924_v48 = vrot.slane %v923_v46, 1 }
 0x339   :  { %v1232_v49 = vpop.eup %1231  ;;  %v925_v50 = vmax.f32 %v923_v46, %v924_v48  ;;  %v415_v51 = vadd.f32 %v414_v47, %v413_v44 }
 0x33a   :  { %v585_v52 = vsel %vm400_vm4, %v1232_v49, 0.0 }
 0x33b   :  { %v586_v53 = vrot.slane %v585_v52, 4  ;;  %v926_v54 = vsub.f32 %v915_v32, %v925_v50  ;;  %v416_v55 = vrot.slane %v415_v51, 1  ;;  %v958_v32 = vpop.permute.xlu0 %957 }
 0x33c   :  { %v963_v34 = vsel %vm445_vm3, %v958_v32, 0 }
 0x33d   :  { %v587_v56 = vadd.f32 %v586_v53, %v585_v52  ;;  %v927_v57 = vmul.f32 1.442695, %v926_v54  ;;  %v417_v58 = vadd.f32 %v416_v55, %v415_v51 }
 0x33f   :  { %v588_v59 = vrot.slane %v587_v56, 2  ;;  %1235 = vpow2.f32 %v927_v57 }
 0x340   :  { %1237 = vrcp.f32 %v417_v58 }
 0x341   :  { %v1234_v60 = vpop.eup %1233  ;;  %v589_v61 = vadd.f32 %v588_v59, %v587_v56 }
 0x342   :  { %v757_v62 = vsel %vm400_vm4, %v1234_v60, 0.0 }
 0x343   :  { %v758_v63 = vrot.slane %v757_v62, 4  ;;  %v590_v1 = vrot.slane %v589_v61, 1 }
 0x345   :  { %v759_v3 = vadd.f32 %v758_v63, %v757_v62  ;;  %v591_v4 = vadd.f32 %v590_v1, %v589_v61 }
 0x347   :  { %v760_v5 = vrot.slane %v759_v3, 2  ;;  %1239 = vrcp.f32 %v591_v4 }
 0x349   :  { %v1236_v7 = vpop.eup %1235  ;;  %v761_v9 = vadd.f32 %v760_v5, %v759_v3 }
 0x34a   :  { %v1238_v10 = vpop.eup %1237  ;;  %v929_v11 = vsel %vm400_vm4, %v1236_v7, 0.0 }
 0x34b   :  { %v930_v12 = vrot.slane %v929_v11, 4  ;;  %v419_v40 = vmul.f32 %v1238_v10, %v1230_v35  ;;  %v762_v13 = vrot.slane %v761_v9, 1 }
 0x34d   :  { %v931_v14 = vadd.f32 %v930_v12, %v929_v11  ;;  %v420_v16 = vpack.c.bf16 %v419_v40, %v419_v40  ;;  %v763_v17 = vadd.f32 %v762_v13, %v761_v9 }
 0x34f   :  { %v932_v18 = vrot.slane %v931_v14, 2  ;;  %422 = vxpose.xlu1.c.b16.start.end [1/1] (short) (narrow) %v420_v16, 16  ;;  %1241 = vrcp.f32 %v763_v17 }
 0x351   :  { %v1240_v19 = vpop.eup %1239  ;;  %v933_v20 = vadd.f32 %v932_v18, %v931_v14 }
 0x352   :  { %v593_v21 = vmul.f32 %v1240_v19, %v1232_v49 }
 0x353   :  { %v934_v15 = vrot.slane %v933_v20, 1 }
 0x354   :  { %v594_v24 = vpack.c.bf16 %v593_v21, %v593_v21 }
 0x355   :  { %v935_v22 = vadd.f32 %v934_v15, %v933_v20 }
 0x356   :  { %596 = vxpose.xlu0.c.b16.start.end [1/1] (short) (narrow) %v594_v24, 16 }
 0x357   :  { %1243 = vrcp.f32 %v935_v22 }
 0x359   :  { %v1242_v25 = vpop.eup %1241 }
 0x35a   :  { %v765_v0 = vmul.f32 %v1242_v25, %v1234_v60 }
 0x35c   :  { %v766_v23 = vpack.c.bf16 %v765_v0, %v765_v0 }
 0x35e   :  { %768 = vxpose.xlu0.c.b16.start.end [1/1] (short) (narrow) %v766_v23, 16 }
 0x361   :  { %v1244_v26 = vpop.eup %1243 }
 0x362   :  { %v937_v27 = vmul.f32 %v1244_v26, %v1236_v7 }
 0x364   :  { %v938_v28 = vpack.c.bf16 %v937_v27, %v937_v27 }
 0x366   :  { %940 = vxpose.xlu1.c.b16.start.end [1/1] (short) (narrow) %v938_v28, 16 }
 0x3b5   :  { %v430_v31 = vpop.trf.xlu1 }
 0x3b6   :  { %1125 = vmatmul.mubr.msk.bf16.vlgmr.msra.gmra.mrb[4].mxu1 %vm441_vm5, %v430_v31 }
 0x3b7   :  { %1140 = vmatpush3.bf16.msra.mxu1 %v619_v2  ;;  %1141 = vmatprep.mubr.msk.bf16.mxu1 %vm1322_vm2, %v1321_v36 }
 0x3b8   :  { %1156 = vmatprep.subr.bf16.mxu1 %v1321_v36 }
 0x3bc   :  { %v604_v8 = vpop.trf.xlu0 }
 0x3be   :  { %1142 = vmatmul.mubr.msk.bf16.vlgmr.msra.gmra.mrb[8].mxu1 %vm441_vm5, %v604_v8 }
 0x3bf   :  { %1157 = vmatpush3.bf16.msra.mxu1 %v791_v6  ;;  %1158 = vmatprep.mubr.msk.bf16.mxu1 %vm1322_vm2, %v1321_v36 }
 0x3c0   :  { %1173 = vmatprep.subr.bf16.mxu1 %v1321_v36 }
 0x3c4   :  { %v776_v33 = vpop.trf.xlu0 }
 0x3c6   :  { %1159 = vmatmul.mubr.msk.bf16.vlgmr.msra.gmra.mrb[12].mxu1 %vm441_vm5, %v776_v33 }
 0x3c7   :  { %1174 = vmatpush3.bf16.msra.mxu1 %v963_v34  ;;  %1175 = vmatprep.mubr.msk.bf16.mxu1 %vm1322_vm2, %v1321_v36 }
 0x3cc   :  { %v948_v35 = vpop.trf.xlu1 }
 0x3ce   :  { %1176 = vmatmul.mubr.msk.bf16.vlgmr.msra.gmra.mrb[16].mxu1 %vm441_vm5, %v948_v35 }
 0x3cf   :  { %1300 = shalt.err (!%p1297_p6)
}
 0x3d0   :  { %s1301_s20 = scalar_lea.hbm %s1590_s10, 512 }
 0x3d1   :  { %p1302_p7 = scmp.ne.s32.totalorder %s1590_s10, %s1301_s20  ;;  %p1305_p8 = scmp.lt.u32.totalorder %s1301_s20, %s1590_s10 }
 0x3d3   :  { %p1307_p9 = pnand %p1305_p8, %p1302_p7 }
 0x3d5   :  { %1310 = shalt.err (!%p1307_p9)
}
 0x3d6   :  { %s1326_s23 = smov 128   ;;  %s1327_s1 = smov 8   ;;  %v321_v36 = vld [vmem:[%s1587_s7] sm:$0xf]  ;;  %vm1013_vm6 = vcmask 1040384   ;;  %vm1015_vm7 = vcmask 1041408  }
 0x3d7   :  { %1033 = dma.vmem_to_hbm [thread:$0]  %s1028_s4, 512, %s1590_s10, [#allocation4], %s1326_s23, %s1326_s23, %s1327_s1   ;;  %vm1017_vm8 = vcmask 1042432  }
 0x489   :  { %v483_v37 = vpop.f32.mrb[4].mxu1 }
 0x48a   :  { %v489_v38 = vmul.f32 %v483_v37, %v321_v36  ;;  %v1126_v39 = vpop.f32.mrb[5].mxu1 }
 0x48b   :  { %v486_v41 = vpop.f32.mrb[6].mxu1 }
 0x48c   :  { %v490_v42 = vsel %vm241_vm1, %v489_v38, 0.0  ;;  %v1127_v43 = vpop.f32.mrb[7].mxu1 }
 0x48d   :  { %v491_v44 = vrot.slane %v490_v42, 4 }
 0x48f   :  { %v492_v45 = vadd.f32 %v491_v44, %v490_v42 }
 0x491   :  { %v655_v46 = vpop.f32.mrb[8].mxu1  ;;  %v493_v49 = vrot.slane %v492_v45, 2 }
 0x492   :  { %v661_v47 = vmul.f32 %v655_v46, %v321_v36  ;;  %v1143_v48 = vpop.f32.mrb[9].mxu1 }
 0x493   :  { %v658_v50 = vpop.f32.mrb[10].mxu1  ;;  %v494_v54 = vadd.f32 %v493_v49, %v492_v45 }
 0x494   :  { %v662_v51 = vsel %vm241_vm1, %v661_v47, 0.0  ;;  %v1144_v52 = vpop.f32.mrb[11].mxu1 }
 0x495   :  { %v663_v53 = vrot.slane %v662_v51, 4  ;;  %v495_v60 = vrot.slane %v494_v54, 1 }
 0x497   :  { %v664_v55 = vadd.f32 %v663_v53, %v662_v51  ;;  %v496_v5 = vadd.f32 %v495_v60, %v494_v54 }
 0x499   :  { %v665_v56 = vrot.slane %v664_v55, 2  ;;  %v827_v57 = vpop.f32.mrb[12].mxu1 }
 0x49a   :  { %v833_v58 = vmul.f32 %v827_v57, %v321_v36  ;;  %v1160_v59 = vpop.f32.mrb[13].mxu1 }
 0x49b   :  { %v666_v61 = vadd.f32 %v665_v56, %v664_v55  ;;  %v830_v62 = vpop.f32.mrb[14].mxu1 }
 0x49c   :  { %v834_v63 = vsel %vm241_vm1, %v833_v58, 0.0  ;;  %v1161_v1 = vpop.f32.mrb[15].mxu1 }
 0x49d   :  { %v667_v3 = vrot.slane %v666_v61, 1  ;;  %v835_v4 = vrot.slane %v834_v63, 4 }
 0x49f   :  { %v668_v7 = vadd.f32 %v667_v3, %v666_v61  ;;  %v836_v9 = vadd.f32 %v835_v4, %v834_v63 }
 0x4a1   :  { %v1014_v10 = vsel %vm1013_vm6, %v496_v5, %v668_v7  ;;  %v837_v11 = vrot.slane %v836_v9, 2  ;;  %v999_v12 = vpop.f32.mrb[16].mxu1 }
 0x4a2   :  { %v1005_v40 = vmul.f32 %v999_v12, %v321_v36  ;;  %v1177_v13 = vpop.f32.mrb[17].mxu1 }
 0x4a3   :  { %v838_v14 = vadd.f32 %v837_v11, %v836_v9  ;;  %v1002_v16 = vpop.f32.mrb[18].mxu1 }
 0x4a4   :  { %v1006_v17 = vsel %vm241_vm1, %v1005_v40, 0.0  ;;  %v1178_v18 = vpop.f32.mrb[19].mxu1 }
 0x4a5   :  { %v839_v19 = vrot.slane %v838_v14, 1  ;;  %v1007_v20 = vrot.slane %v1006_v17, 4 }
 0x4a7   :  { %v840_v21 = vadd.f32 %v839_v19, %v838_v14  ;;  %v1008_v15 = vadd.f32 %v1007_v20, %v1006_v17 }
 0x4a9   :  { %v1016_v24 = vsel %vm1015_vm7, %v1014_v10, %v840_v21  ;;  %v1009_v22 = vrot.slane %v1008_v15, 2 }
 0x4ab   :  { %v1010_v25 = vadd.f32 %v1009_v22, %v1008_v15 }
 0x4ad   :  { %v1011_v0 = vrot.slane %v1010_v25, 1 }
 0x4af   :  { %v1012_v23 = vadd.f32 %v1011_v0, %v1010_v25 }
 0x4b1   :  { %v1018_v26 = vsel %vm1017_vm8, %v1016_v24, %v1012_v23 }
 0x4b2   :  { %1019 = vst.msk [vmem:[%s1589_s9] sm:$0xf] %vm241_vm1, %v1018_v26 }
 0x4b3   :  { %1315 = dma.done.wait [#allocation4], 512  }
 0x4b4   :  { %1316 = vsyncadd [#allocation4], 4294966784 }
 0x4b5   :  { %1039 = vsyncpa [#allocation3], 1 }
 0x4b6   :  { %1040 = vsyncpa [#allocation6], 1 }
 0x4b7   :  { %1041 = vsyncpa [#allocation4], 1 }

</bundles_post_ra>
